<compile_context>
chip_gen: v7x
topology: tpu7x:2x2x1
jax: 0.10.0
libtpu: 0.0.40
codegen_flags: <defaults>
</compile_context>

<pallas_src>
import math

import jax
import jax.numpy as jnp
from jax import lax
from jax.experimental import pallas as pl
from jax.experimental.pallas import tpu as pltpu

INPUT_DIM = 200          # 100 * 2
INT_DIM = 100
OUTPUT_DIMS = (1, 20, 20)
OUTPUT_DIM = 1 * 20 * 20  # 400
N_INCEPTION = 10
EPS = 1e-5

# Lane-padded feature dims (multiples of 128; zero-padded weights/gammas make
# the extra columns/rows inert for the real outputs).
INPUT_PAD = 256
INT_PAD = 128
OUTPUT_PAD = 512

# Inception sub-output sizes (sum must equal INT_DIM so the block is 100 -> 100)
_INC_SPLITS = (math.ceil(INT_DIM / 2), int(INT_DIM / 4),
               math.ceil(INT_DIM / 12), int(INT_DIM / 6))
assert sum(_INC_SPLITS) == INT_DIM, _INC_SPLITS


def _bn_sigmoid(z, gamma, beta):
    # BatchNorm1d, training mode (batch statistics, biased variance), folded
    # into a per-feature scale/shift, followed by Sigmoid.  Shifted two-pass
    # variance E[(z-mu)^2] avoids cancellation; per-feature math (scale) runs
    # on a (1, INT_PAD) row, per-element path is 3 VPU ops + the EUP sigmoid.
    mu = jnp.mean(z, axis=0, keepdims=True)
    d = z - mu
    var = jnp.mean(d * d, axis=0, keepdims=True)
    scale = gamma * lax.rsqrt(var + EPS)          # (1, F)
    return jax.nn.sigmoid(d * scale + beta)       # (B, F) f32


def inception_net_kernel(x_ref, w0_ref, g0_ref, be0_ref,
                         winc_ref, ginc_ref, beinc_ref,
                         wout_ref, bout_ref, out_ref):
    # Single invocation: every operand is fully resident in VMEM.
    # First layer: Linear(200->100) [bias dropped, cancelled by BN] + BN + Sigmoid.
    z0 = jnp.dot(x_ref[...].astype(jnp.bfloat16), w0_ref[...],
                 preferred_element_type=jnp.float32)            # (B, 128) f32
    h = _bn_sigmoid(z0, g0_ref[...], be0_ref[...]).astype(jnp.bfloat16)

    # 10 inception blocks: each is one 128x128 matmul (4 concatenated Linears,
    # bias dropped) + BN + Sigmoid.  Unrolled for LLO scheduling visibility;
    # carried activation h stays bf16 (matmul operand), epilogue math f32.
    def layer(l, h):
        z = jnp.dot(h, winc_ref[l], preferred_element_type=jnp.float32)
        return _bn_sigmoid(z, ginc_ref[l], beinc_ref[l]).astype(jnp.bfloat16)

    h = lax.fori_loop(0, N_INCEPTION, layer, h, unroll=True)

    # Output layer: Linear(100->400) + Sigmoid (bias kept, no BN follows).
    z = jnp.dot(h, wout_ref[...],
                preferred_element_type=jnp.float32) + bout_ref[...]
    out_ref[...] = jax.nn.sigmoid(z)                             # (B, 512) f32


def inception_net(x, packed):
    """Glue: flatten like x.view(-1, input_dim), run kernel, slice off the
    lane padding and reshape like x.view(-1, 1, 20, 20)."""
    (w0, g0, be0, winc, ginc, beinc, wout, bout) = packed
    x = jnp.reshape(x, (-1, INPUT_DIM)).astype(jnp.float32)
    batch = x.shape[0]
    x_pad = jnp.pad(x, ((0, 0), (0, INPUT_PAD - INPUT_DIM)))

    cost = pl.CostEstimate(
        flops=2 * batch * (INPUT_DIM * INT_DIM
                           + N_INCEPTION * INT_DIM * INT_DIM
                           + INT_DIM * OUTPUT_DIM),
        transcendentals=batch * ((N_INCEPTION + 1) * INT_DIM + OUTPUT_DIM),
        bytes_accessed=int((w0.size + winc.size + wout.size) * 2
                           + (x_pad.size + batch * OUTPUT_PAD) * 4),
    )

    # Resident VMEM footprint: bf16 weights + f32 BN params + f32 x/out blocks
    # + a few activation-sized temporaries; clamp into a safe scoped range
    # (>= v6e/v7x default of 32 MiB, below v7x's 64 MiB physical VMEM).
    weight_bytes = 2 * (w0.size + winc.size + wout.size) \
        + 4 * (g0.size + be0.size + ginc.size + beinc.size + bout.size)
    act_bytes = 4 * batch * (INPUT_PAD + OUTPUT_PAD + 4 * INT_PAD)
    vmem_limit = int(min(max(weight_bytes + act_bytes + (4 << 20), 32 << 20),
                         48 << 20))

    vmem = pltpu.MemorySpace.VMEM
    out = pl.pallas_call(
        inception_net_kernel,
        out_shape=jax.ShapeDtypeStruct((batch, OUTPUT_PAD), jnp.float32),
        in_specs=[pl.BlockSpec(memory_space=vmem)] * 9,
        out_specs=pl.BlockSpec(memory_space=vmem),
        compiler_params=pltpu.CompilerParams(vmem_limit_bytes=vmem_limit),
        cost_estimate=cost,
    )(x_pad, w0, g0, be0, winc, ginc, beinc, wout, bout)

    return jnp.reshape(out[:, :OUTPUT_DIM], (-1,) + OUTPUT_DIMS)


def init_params(key):
    """Deterministic synthetic logical parameters, PyTorch-style
    uniform(-1/sqrt(fan_in)) init, stored as (in_features, out_features)."""
    def linear(k, fan_in, fan_out):
        kw, kb = jax.random.split(k)
        bound = 1.0 / math.sqrt(fan_in)
        w = jax.random.uniform(kw, (fan_in, fan_out), jnp.float32, -bound, bound)
        b = jax.random.uniform(kb, (1, fan_out), jnp.float32, -bound, bound)
        return w, b

    keys = jax.random.split(key, N_INCEPTION + 2)

    w0, b0 = linear(keys[0], INPUT_DIM, INT_DIM)
    g0 = jnp.ones((1, INT_DIM), jnp.float32)       # BatchNorm1d default gamma
    be0 = jnp.zeros((1, INT_DIM), jnp.float32)     # BatchNorm1d default beta

    winc, binc = [], []
    for i in range(N_INCEPTION):
        sub_keys = jax.random.split(keys[1 + i], len(_INC_SPLITS))
        ws, bs = zip(*[linear(sk, INT_DIM, d)
                       for sk, d in zip(sub_keys, _INC_SPLITS)])
        winc.append(jnp.concatenate(ws, axis=1))   # (100, 100)
        binc.append(jnp.concatenate(bs, axis=1))   # (1, 100)
    winc = jnp.stack(winc)                         # (10, 100, 100)
    binc = jnp.stack(binc)                         # (10, 1, 100)
    ginc = jnp.ones((N_INCEPTION, 1, INT_DIM), jnp.float32)
    beinc = jnp.zeros((N_INCEPTION, 1, INT_DIM), jnp.float32)

    wout, bout = linear(keys[-1], INT_DIM, OUTPUT_DIM)

    return (w0, b0, g0, be0, winc, binc, ginc, beinc, wout, bout)


def pack_params(params):
    """Pad feature dims to lane multiples, cast matmul weights to bf16, and
    drop the biases that are exactly cancelled by training-mode BatchNorm."""
    (w0, b0, g0, be0, winc, binc, ginc, beinc, wout, bout) = params
    del b0, binc  # constant per-feature bias is removed by the batch-mean sub.

    def pad2(a, rows, cols):
        return jnp.pad(a, ((0, rows - a.shape[0]), (0, cols - a.shape[1])))

    w0p = pad2(w0, INPUT_PAD, INT_PAD).astype(jnp.bfloat16)
    g0p = pad2(g0, 1, INT_PAD)
    be0p = pad2(be0, 1, INT_PAD)

    wincp = jnp.pad(
        winc, ((0, 0), (0, INT_PAD - INT_DIM), (0, INT_PAD - INT_DIM))
    ).astype(jnp.bfloat16)
    gincp = jnp.pad(ginc, ((0, 0), (0, 0), (0, INT_PAD - INT_DIM)))
    beincp = jnp.pad(beinc, ((0, 0), (0, 0), (0, INT_PAD - INT_DIM)))

    woutp = pad2(wout, INT_PAD, OUTPUT_PAD).astype(jnp.bfloat16)
    boutp = pad2(bout, 1, OUTPUT_PAD)

    return (w0p, g0p, be0p, wincp, gincp, beincp, woutp, boutp)


if __name__ == "__main__":
    key = jax.random.PRNGKey(0)
    pkey, xkey = jax.random.split(key)
    params = init_params(pkey)
    packed = pack_params(params)
    x = jax.random.normal(xkey, (8, INPUT_DIM), jnp.float32)   # batch=8, dim=200

    out = inception_net(x, packed)
    out = jax.block_until_ready(out)

    assert out.shape == (8,) + OUTPUT_DIMS, out.shape
    assert bool(jnp.all(jnp.isfinite(out)))
    assert bool(jnp.all((out >= 0.0) & (out <= 1.0)))  # final sigmoid range
    print("KERNEL_OK")
</pallas_src>

<mosaic_0001>
module attributes {stable_mosaic.version = 11 : i64} {
  func.func @inception_net_kernel(%arg0: memref<8x256xf32, #tpu.memory_space<vmem>>, %arg1: memref<256x128xbf16, #tpu.memory_space<vmem>>, %arg2: memref<1x128xf32, #tpu.memory_space<vmem>>, %arg3: memref<1x128xf32, #tpu.memory_space<vmem>>, %arg4: memref<10x128x128xbf16, #tpu.memory_space<vmem>>, %arg5: memref<10x1x128xf32, #tpu.memory_space<vmem>>, %arg6: memref<10x1x128xf32, #tpu.memory_space<vmem>>, %arg7: memref<128x512xbf16, #tpu.memory_space<vmem>>, %arg8: memref<1x512xf32, #tpu.memory_space<vmem>>, %arg9: memref<8x512xf32, #tpu.memory_space<vmem>>) attributes {dimension_semantics = [], scalar_prefetch = 0 : i64, scratch_operands = 0 : i64, tpu.core_type = #tpu.core_type<tc>} {
    %c0 = arith.constant 0 : index
    %c0_0 = arith.constant 0 : index
    %0 = vector.load %arg0[%c0, %c0_0] : memref<8x256xf32, #tpu.memory_space<vmem>>, vector<8x256xf32>
    %1 = arith.truncf %0 : vector<8x256xf32> to vector<8x256xbf16>
    %c0_1 = arith.constant 0 : index
    %c0_2 = arith.constant 0 : index
    %2 = vector.load %arg1[%c0_1, %c0_2] : memref<256x128xbf16, #tpu.memory_space<vmem>>, vector<256x128xbf16>
    %cst = arith.constant dense<0.000000e+00> : vector<8x128xf32>
    %3 = tpu.matmul %1, %2, %cst {dimension_numbers = #tpu.dot_dimension_numbers<[1], [0], [0], [1], [0, 0, 1, 1], [], []>} : vector<8x256xbf16>, vector<256x128xbf16>, vector<8x128xf32> -> vector<8x128xf32>
    %c0_3 = arith.constant 0 : index
    %c0_4 = arith.constant 0 : index
    %4 = vector.load %arg2[%c0_3, %c0_4] : memref<1x128xf32, #tpu.memory_space<vmem>>, vector<1x128xf32>
    %c0_5 = arith.constant 0 : index
    %c0_6 = arith.constant 0 : index
    %5 = vector.load %arg3[%c0_5, %c0_6] : memref<1x128xf32, #tpu.memory_space<vmem>>, vector<1x128xf32>
    %cst_7 = arith.constant dense<0.000000e+00> : vector<128xf32>
    %6 = vector.multi_reduction <add>, %3, %cst_7 [0] : vector<8x128xf32> to vector<128xf32>
    %7 = vector.shape_cast %6 : vector<128xf32> to vector<1x128xf32>
    %cst_8 = arith.constant 8.000000e+00 : f32
    %8 = vector.broadcast %cst_8 : f32 to vector<1x128xf32>
    %9 = arith.divf %7, %8 : vector<1x128xf32>
    %10 = vector.broadcast %9 : vector<1x128xf32> to vector<8x128xf32>
    %11 = arith.subf %3, %10 : vector<8x128xf32>
    %12 = arith.mulf %11, %11 : vector<8x128xf32>
    %cst_9 = arith.constant dense<0.000000e+00> : vector<128xf32>
    %13 = vector.multi_reduction <add>, %12, %cst_9 [0] : vector<8x128xf32> to vector<128xf32>
    %14 = vector.shape_cast %13 : vector<128xf32> to vector<1x128xf32>
    %cst_10 = arith.constant 8.000000e+00 : f32
    %15 = vector.broadcast %cst_10 : f32 to vector<1x128xf32>
    %16 = arith.divf %14, %15 : vector<1x128xf32>
    %cst_11 = arith.constant 9.99999974E-6 : f32
    %17 = vector.broadcast %cst_11 : f32 to vector<1x128xf32>
    %18 = arith.addf %16, %17 : vector<1x128xf32>
    %19 = math.rsqrt %18 : vector<1x128xf32>
    %20 = arith.mulf %4, %19 : vector<1x128xf32>
    %21 = vector.broadcast %20 : vector<1x128xf32> to vector<8x128xf32>
    %22 = arith.mulf %11, %21 : vector<8x128xf32>
    %23 = vector.broadcast %5 : vector<1x128xf32> to vector<8x128xf32>
    %24 = arith.addf %22, %23 : vector<8x128xf32>
    %25 = arith.negf %24 : vector<8x128xf32>
    %26 = math.exp %25 : vector<8x128xf32>
    %cst_12 = arith.constant 1.000000e+00 : f32
    %27 = vector.broadcast %cst_12 : f32 to vector<8x128xf32>
    %28 = arith.addf %27, %26 : vector<8x128xf32>
    %29 = arith.divf %27, %28 : vector<8x128xf32>
    %30 = arith.truncf %29 : vector<8x128xf32> to vector<8x128xbf16>
    %c0_i32 = arith.constant 0 : i32
    %31 = arith.index_cast %c0_i32 : i32 to index
    %c0_13 = arith.constant 0 : index
    %c0_14 = arith.constant 0 : index
    %32 = vector.load %arg4[%31, %c0_13, %c0_14] : memref<10x128x128xbf16, #tpu.memory_space<vmem>>, vector<1x128x128xbf16>
    %33 = vector.shape_cast %32 : vector<1x128x128xbf16> to vector<128x128xbf16>
    %cst_15 = arith.constant dense<0.000000e+00> : vector<8x128xf32>
    %34 = tpu.matmul %30, %33, %cst_15 {dimension_numbers = #tpu.dot_dimension_numbers<[1], [0], [0], [1], [0, 0, 1, 1], [], []>} : vector<8x128xbf16>, vector<128x128xbf16>, vector<8x128xf32> -> vector<8x128xf32>
    %35 = arith.index_cast %c0_i32 : i32 to index
    %c0_16 = arith.constant 0 : index
    %c0_17 = arith.constant 0 : index
    %36 = vector.load %arg5[%35, %c0_16, %c0_17] : memref<10x1x128xf32, #tpu.memory_space<vmem>>, vector<1x1x128xf32>
    %37 = vector.shape_cast %36 : vector<1x1x128xf32> to vector<1x128xf32>
    %38 = arith.index_cast %c0_i32 : i32 to index
    %c0_18 = arith.constant 0 : index
    %c0_19 = arith.constant 0 : index
    %39 = vector.load %arg6[%38, %c0_18, %c0_19] : memref<10x1x128xf32, #tpu.memory_space<vmem>>, vector<1x1x128xf32>
    %40 = vector.shape_cast %39 : vector<1x1x128xf32> to vector<1x128xf32>
    %cst_20 = arith.constant dense<0.000000e+00> : vector<128xf32>
    %41 = vector.multi_reduction <add>, %34, %cst_20 [0] : vector<8x128xf32> to vector<128xf32>
    %42 = vector.shape_cast %41 : vector<128xf32> to vector<1x128xf32>
    %cst_21 = arith.constant 8.000000e+00 : f32
    %43 = vector.broadcast %cst_21 : f32 to vector<1x128xf32>
    %44 = arith.divf %42, %43 : vector<1x128xf32>
    %45 = vector.broadcast %44 : vector<1x128xf32> to vector<8x128xf32>
    %46 = arith.subf %34, %45 : vector<8x128xf32>
    %47 = arith.mulf %46, %46 : vector<8x128xf32>
    %cst_22 = arith.constant dense<0.000000e+00> : vector<128xf32>
    %48 = vector.multi_reduction <add>, %47, %cst_22 [0] : vector<8x128xf32> to vector<128xf32>
    %49 = vector.shape_cast %48 : vector<128xf32> to vector<1x128xf32>
    %cst_23 = arith.constant 8.000000e+00 : f32
    %50 = vector.broadcast %cst_23 : f32 to vector<1x128xf32>
    %51 = arith.divf %49, %50 : vector<1x128xf32>
    %cst_24 = arith.constant 9.99999974E-6 : f32
    %52 = vector.broadcast %cst_24 : f32 to vector<1x128xf32>
    %53 = arith.addf %51, %52 : vector<1x128xf32>
    %54 = math.rsqrt %53 : vector<1x128xf32>
    %55 = arith.mulf %37, %54 : vector<1x128xf32>
    %56 = vector.broadcast %55 : vector<1x128xf32> to vector<8x128xf32>
    %57 = arith.mulf %46, %56 : vector<8x128xf32>
    %58 = vector.broadcast %40 : vector<1x128xf32> to vector<8x128xf32>
    %59 = arith.addf %57, %58 : vector<8x128xf32>
    %60 = arith.negf %59 : vector<8x128xf32>
    %61 = math.exp %60 : vector<8x128xf32>
    %cst_25 = arith.constant 1.000000e+00 : f32
    %62 = vector.broadcast %cst_25 : f32 to vector<8x128xf32>
    %63 = arith.addf %62, %61 : vector<8x128xf32>
    %64 = arith.divf %62, %63 : vector<8x128xf32>
    %65 = arith.truncf %64 : vector<8x128xf32> to vector<8x128xbf16>
    %c1_i32 = arith.constant 1 : i32
    %66 = arith.index_cast %c1_i32 : i32 to index
    %c0_26 = arith.constant 0 : index
    %c0_27 = arith.constant 0 : index
    %67 = vector.load %arg4[%66, %c0_26, %c0_27] : memref<10x128x128xbf16, #tpu.memory_space<vmem>>, vector<1x128x128xbf16>
    %68 = vector.shape_cast %67 : vector<1x128x128xbf16> to vector<128x128xbf16>
    %cst_28 = arith.constant dense<0.000000e+00> : vector<8x128xf32>
    %69 = tpu.matmul %65, %68, %cst_28 {dimension_numbers = #tpu.dot_dimension_numbers<[1], [0], [0], [1], [0, 0, 1, 1], [], []>} : vector<8x128xbf16>, vector<128x128xbf16>, vector<8x128xf32> -> vector<8x128xf32>
    %70 = arith.index_cast %c1_i32 : i32 to index
    %c0_29 = arith.constant 0 : index
    %c0_30 = arith.constant 0 : index
    %71 = vector.load %arg5[%70, %c0_29, %c0_30] : memref<10x1x128xf32, #tpu.memory_space<vmem>>, vector<1x1x128xf32>
    %72 = vector.shape_cast %71 : vector<1x1x128xf32> to vector<1x128xf32>
    %73 = arith.index_cast %c1_i32 : i32 to index
    %c0_31 = arith.constant 0 : index
    %c0_32 = arith.constant 0 : index
    %74 = vector.load %arg6[%73, %c0_31, %c0_32] : memref<10x1x128xf32, #tpu.memory_space<vmem>>, vector<1x1x128xf32>
    %75 = vector.shape_cast %74 : vector<1x1x128xf32> to vector<1x128xf32>
    %cst_33 = arith.constant dense<0.000000e+00> : vector<128xf32>
    %76 = vector.multi_reduction <add>, %69, %cst_33 [0] : vector<8x128xf32> to vector<128xf32>
    %77 = vector.shape_cast %76 : vector<128xf32> to vector<1x128xf32>
    %cst_34 = arith.constant 8.000000e+00 : f32
    %78 = vector.broadcast %cst_34 : f32 to vector<1x128xf32>
    %79 = arith.divf %77, %78 : vector<1x128xf32>
    %80 = vector.broadcast %79 : vector<1x128xf32> to vector<8x128xf32>
    %81 = arith.subf %69, %80 : vector<8x128xf32>
    %82 = arith.mulf %81, %81 : vector<8x128xf32>
    %cst_35 = arith.constant dense<0.000000e+00> : vector<128xf32>
    %83 = vector.multi_reduction <add>, %82, %cst_35 [0] : vector<8x128xf32> to vector<128xf32>
    %84 = vector.shape_cast %83 : vector<128xf32> to vector<1x128xf32>
    %cst_36 = arith.constant 8.000000e+00 : f32
    %85 = vector.broadcast %cst_36 : f32 to vector<1x128xf32>
    %86 = arith.divf %84, %85 : vector<1x128xf32>
    %cst_37 = arith.constant 9.99999974E-6 : f32
    %87 = vector.broadcast %cst_37 : f32 to vector<1x128xf32>
    %88 = arith.addf %86, %87 : vector<1x128xf32>
    %89 = math.rsqrt %88 : vector<1x128xf32>
    %90 = arith.mulf %72, %89 : vector<1x128xf32>
    %91 = vector.broadcast %90 : vector<1x128xf32> to vector<8x128xf32>
    %92 = arith.mulf %81, %91 : vector<8x128xf32>
    %93 = vector.broadcast %75 : vector<1x128xf32> to vector<8x128xf32>
    %94 = arith.addf %92, %93 : vector<8x128xf32>
    %95 = arith.negf %94 : vector<8x128xf32>
    %96 = math.exp %95 : vector<8x128xf32>
    %cst_38 = arith.constant 1.000000e+00 : f32
    %97 = vector.broadcast %cst_38 : f32 to vector<8x128xf32>
    %98 = arith.addf %97, %96 : vector<8x128xf32>
    %99 = arith.divf %97, %98 : vector<8x128xf32>
    %100 = arith.truncf %99 : vector<8x128xf32> to vector<8x128xbf16>
    %c2_i32 = arith.constant 2 : i32
    %101 = arith.index_cast %c2_i32 : i32 to index
    %c0_39 = arith.constant 0 : index
    %c0_40 = arith.constant 0 : index
    %102 = vector.load %arg4[%101, %c0_39, %c0_40] : memref<10x128x128xbf16, #tpu.memory_space<vmem>>, vector<1x128x128xbf16>
    %103 = vector.shape_cast %102 : vector<1x128x128xbf16> to vector<128x128xbf16>
    %cst_41 = arith.constant dense<0.000000e+00> : vector<8x128xf32>
    %104 = tpu.matmul %100, %103, %cst_41 {dimension_numbers = #tpu.dot_dimension_numbers<[1], [0], [0], [1], [0, 0, 1, 1], [], []>} : vector<8x128xbf16>, vector<128x128xbf16>, vector<8x128xf32> -> vector<8x128xf32>
    %105 = arith.index_cast %c2_i32 : i32 to index
    %c0_42 = arith.constant 0 : index
    %c0_43 = arith.constant 0 : index
    %106 = vector.load %arg5[%105, %c0_42, %c0_43] : memref<10x1x128xf32, #tpu.memory_space<vmem>>, vector<1x1x128xf32>
    %107 = vector.shape_cast %106 : vector<1x1x128xf32> to vector<1x128xf32>
    %108 = arith.index_cast %c2_i32 : i32 to index
    %c0_44 = arith.constant 0 : index
    %c0_45 = arith.constant 0 : index
    %109 = vector.load %arg6[%108, %c0_44, %c0_45] : memref<10x1x128xf32, #tpu.memory_space<vmem>>, vector<1x1x128xf32>
    %110 = vector.shape_cast %109 : vector<1x1x128xf32> to vector<1x128xf32>
    %cst_46 = arith.constant dense<0.000000e+00> : vector<128xf32>
    %111 = vector.multi_reduction <add>, %104, %cst_46 [0] : vector<8x128xf32> to vector<128xf32>
    %112 = vector.shape_cast %111 : vector<128xf32> to vector<1x128xf32>
    %cst_47 = arith.constant 8.000000e+00 : f32
    %113 = vector.broadcast %cst_47 : f32 to vector<1x128xf32>
    %114 = arith.divf %112, %113 : vector<1x128xf32>
    %115 = vector.broadcast %114 : vector<1x128xf32> to vector<8x128xf32>
    %116 = arith.subf %104, %115 : vector<8x128xf32>
    %117 = arith.mulf %116, %116 : vector<8x128xf32>
    %cst_48 = arith.constant dense<0.000000e+00> : vector<128xf32>
    %118 = vector.multi_reduction <add>, %117, %cst_48 [0] : vector<8x128xf32> to vector<128xf32>
    %119 = vector.shape_cast %118 : vector<128xf32> to vector<1x128xf32>
    %cst_49 = arith.constant 8.000000e+00 : f32
    %120 = vector.broadcast %cst_49 : f32 to vector<1x128xf32>
    %121 = arith.divf %119, %120 : vector<1x128xf32>
    %cst_50 = arith.constant 9.99999974E-6 : f32
    %122 = vector.broadcast %cst_50 : f32 to vector<1x128xf32>
    %123 = arith.addf %121, %122 : vector<1x128xf32>
    %124 = math.rsqrt %123 : vector<1x128xf32>
    %125 = arith.mulf %107, %124 : vector<1x128xf32>
    %126 = vector.broadcast %125 : vector<1x128xf32> to vector<8x128xf32>
    %127 = arith.mulf %116, %126 : vector<8x128xf32>
    %128 = vector.broadcast %110 : vector<1x128xf32> to vector<8x128xf32>
    %129 = arith.addf %127, %128 : vector<8x128xf32>
    %130 = arith.negf %129 : vector<8x128xf32>
    %131 = math.exp %130 : vector<8x128xf32>
    %cst_51 = arith.constant 1.000000e+00 : f32
    %132 = vector.broadcast %cst_51 : f32 to vector<8x128xf32>
    %133 = arith.addf %132, %131 : vector<8x128xf32>
    %134 = arith.divf %132, %133 : vector<8x128xf32>
    %135 = arith.truncf %134 : vector<8x128xf32> to vector<8x128xbf16>
    %c3_i32 = arith.constant 3 : i32
    %136 = arith.index_cast %c3_i32 : i32 to index
    %c0_52 = arith.constant 0 : index
    %c0_53 = arith.constant 0 : index
    %137 = vector.load %arg4[%136, %c0_52, %c0_53] : memref<10x128x128xbf16, #tpu.memory_space<vmem>>, vector<1x128x128xbf16>
    %138 = vector.shape_cast %137 : vector<1x128x128xbf16> to vector<128x128xbf16>
    %cst_54 = arith.constant dense<0.000000e+00> : vector<8x128xf32>
    %139 = tpu.matmul %135, %138, %cst_54 {dimension_numbers = #tpu.dot_dimension_numbers<[1], [0], [0], [1], [0, 0, 1, 1], [], []>} : vector<8x128xbf16>, vector<128x128xbf16>, vector<8x128xf32> -> vector<8x128xf32>
    %140 = arith.index_cast %c3_i32 : i32 to index
    %c0_55 = arith.constant 0 : index
    %c0_56 = arith.constant 0 : index
    %141 = vector.load %arg5[%140, %c0_55, %c0_56] : memref<10x1x128xf32, #tpu.memory_space<vmem>>, vector<1x1x128xf32>
    %142 = vector.shape_cast %141 : vector<1x1x128xf32> to vector<1x128xf32>
    %143 = arith.index_cast %c3_i32 : i32 to index
    %c0_57 = arith.constant 0 : index
    %c0_58 = arith.constant 0 : index
    %144 = vector.load %arg6[%143, %c0_57, %c0_58] : memref<10x1x128xf32, #tpu.memory_space<vmem>>, vector<1x1x128xf32>
    %145 = vector.shape_cast %144 : vector<1x1x128xf32> to vector<1x128xf32>
    %cst_59 = arith.constant dense<0.000000e+00> : vector<128xf32>
    %146 = vector.multi_reduction <add>, %139, %cst_59 [0] : vector<8x128xf32> to vector<128xf32>
    %147 = vector.shape_cast %146 : vector<128xf32> to vector<1x128xf32>
    %cst_60 = arith.constant 8.000000e+00 : f32
    %148 = vector.broadcast %cst_60 : f32 to vector<1x128xf32>
    %149 = arith.divf %147, %148 : vector<1x128xf32>
    %150 = vector.broadcast %149 : vector<1x128xf32> to vector<8x128xf32>
    %151 = arith.subf %139, %150 : vector<8x128xf32>
    %152 = arith.mulf %151, %151 : vector<8x128xf32>
    %cst_61 = arith.constant dense<0.000000e+00> : vector<128xf32>
    %153 = vector.multi_reduction <add>, %152, %cst_61 [0] : vector<8x128xf32> to vector<128xf32>
    %154 = vector.shape_cast %153 : vector<128xf32> to vector<1x128xf32>
    %cst_62 = arith.constant 8.000000e+00 : f32
    %155 = vector.broadcast %cst_62 : f32 to vector<1x128xf32>
    %156 = arith.divf %154, %155 : vector<1x128xf32>
    %cst_63 = arith.constant 9.99999974E-6 : f32
    %157 = vector.broadcast %cst_63 : f32 to vector<1x128xf32>
    %158 = arith.addf %156, %157 : vector<1x128xf32>
    %159 = math.rsqrt %158 : vector<1x128xf32>
    %160 = arith.mulf %142, %159 : vector<1x128xf32>
    %161 = vector.broadcast %160 : vector<1x128xf32> to vector<8x128xf32>
    %162 = arith.mulf %151, %161 : vector<8x128xf32>
    %163 = vector.broadcast %145 : vector<1x128xf32> to vector<8x128xf32>
    %164 = arith.addf %162, %163 : vector<8x128xf32>
    %165 = arith.negf %164 : vector<8x128xf32>
    %166 = math.exp %165 : vector<8x128xf32>
    %cst_64 = arith.constant 1.000000e+00 : f32
    %167 = vector.broadcast %cst_64 : f32 to vector<8x128xf32>
    %168 = arith.addf %167, %166 : vector<8x128xf32>
    %169 = arith.divf %167, %168 : vector<8x128xf32>
    %170 = arith.truncf %169 : vector<8x128xf32> to vector<8x128xbf16>
    %c4_i32 = arith.constant 4 : i32
    %171 = arith.index_cast %c4_i32 : i32 to index
    %c0_65 = arith.constant 0 : index
    %c0_66 = arith.constant 0 : index
    %172 = vector.load %arg4[%171, %c0_65, %c0_66] : memref<10x128x128xbf16, #tpu.memory_space<vmem>>, vector<1x128x128xbf16>
    %173 = vector.shape_cast %172 : vector<1x128x128xbf16> to vector<128x128xbf16>
    %cst_67 = arith.constant dense<0.000000e+00> : vector<8x128xf32>
    %174 = tpu.matmul %170, %173, %cst_67 {dimension_numbers = #tpu.dot_dimension_numbers<[1], [0], [0], [1], [0, 0, 1, 1], [], []>} : vector<8x128xbf16>, vector<128x128xbf16>, vector<8x128xf32> -> vector<8x128xf32>
    %175 = arith.index_cast %c4_i32 : i32 to index
    %c0_68 = arith.constant 0 : index
    %c0_69 = arith.constant 0 : index
    %176 = vector.load %arg5[%175, %c0_68, %c0_69] : memref<10x1x128xf32, #tpu.memory_space<vmem>>, vector<1x1x128xf32>
    %177 = vector.shape_cast %176 : vector<1x1x128xf32> to vector<1x128xf32>
    %178 = arith.index_cast %c4_i32 : i32 to index
    %c0_70 = arith.constant 0 : index
    %c0_71 = arith.constant 0 : index
    %179 = vector.load %arg6[%178, %c0_70, %c0_71] : memref<10x1x128xf32, #tpu.memory_space<vmem>>, vector<1x1x128xf32>
    %180 = vector.shape_cast %179 : vector<1x1x128xf32> to vector<1x128xf32>
    %cst_72 = arith.constant dense<0.000000e+00> : vector<128xf32>
    %181 = vector.multi_reduction <add>, %174, %cst_72 [0] : vector<8x128xf32> to vector<128xf32>
    %182 = vector.shape_cast %181 : vector<128xf32> to vector<1x128xf32>
    %cst_73 = arith.constant 8.000000e+00 : f32
    %183 = vector.broadcast %cst_73 : f32 to vector<1x128xf32>
    %184 = arith.divf %182, %183 : vector<1x128xf32>
    %185 = vector.broadcast %184 : vector<1x128xf32> to vector<8x128xf32>
    %186 = arith.subf %174, %185 : vector<8x128xf32>
    %187 = arith.mulf %186, %186 : vector<8x128xf32>
    %cst_74 = arith.constant dense<0.000000e+00> : vector<128xf32>
    %188 = vector.multi_reduction <add>, %187, %cst_74 [0] : vector<8x128xf32> to vector<128xf32>
    %189 = vector.shape_cast %188 : vector<128xf32> to vector<1x128xf32>
    %cst_75 = arith.constant 8.000000e+00 : f32
    %190 = vector.broadcast %cst_75 : f32 to vector<1x128xf32>
    %191 = arith.divf %189, %190 : vector<1x128xf32>
    %cst_76 = arith.constant 9.99999974E-6 : f32
    %192 = vector.broadcast %cst_76 : f32 to vector<1x128xf32>
    %193 = arith.addf %191, %192 : vector<1x128xf32>
    %194 = math.rsqrt %193 : vector<1x128xf32>
    %195 = arith.mulf %177, %194 : vector<1x128xf32>
    %196 = vector.broadcast %195 : vector<1x128xf32> to vector<8x128xf32>
    %197 = arith.mulf %186, %196 : vector<8x128xf32>
    %198 = vector.broadcast %180 : vector<1x128xf32> to vector<8x128xf32>
    %199 = arith.addf %197, %198 : vector<8x128xf32>
    %200 = arith.negf %199 : vector<8x128xf32>
    %201 = math.exp %200 : vector<8x128xf32>
    %cst_77 = arith.constant 1.000000e+00 : f32
    %202 = vector.broadcast %cst_77 : f32 to vector<8x128xf32>
    %203 = arith.addf %202, %201 : vector<8x128xf32>
    %204 = arith.divf %202, %203 : vector<8x128xf32>
    %205 = arith.truncf %204 : vector<8x128xf32> to vector<8x128xbf16>
    %c5_i32 = arith.constant 5 : i32
    %206 = arith.index_cast %c5_i32 : i32 to index
    %c0_78 = arith.constant 0 : index
    %c0_79 = arith.constant 0 : index
    %207 = vector.load %arg4[%206, %c0_78, %c0_79] : memref<10x128x128xbf16, #tpu.memory_space<vmem>>, vector<1x128x128xbf16>
    %208 = vector.shape_cast %207 : vector<1x128x128xbf16> to vector<128x128xbf16>
    %cst_80 = arith.constant dense<0.000000e+00> : vector<8x128xf32>
    %209 = tpu.matmul %205, %208, %cst_80 {dimension_numbers = #tpu.dot_dimension_numbers<[1], [0], [0], [1], [0, 0, 1, 1], [], []>} : vector<8x128xbf16>, vector<128x128xbf16>, vector<8x128xf32> -> vector<8x128xf32>
    %210 = arith.index_cast %c5_i32 : i32 to index
    %c0_81 = arith.constant 0 : index
    %c0_82 = arith.constant 0 : index
    %211 = vector.load %arg5[%210, %c0_81, %c0_82] : memref<10x1x128xf32, #tpu.memory_space<vmem>>, vector<1x1x128xf32>
    %212 = vector.shape_cast %211 : vector<1x1x128xf32> to vector<1x128xf32>
    %213 = arith.index_cast %c5_i32 : i32 to index
    %c0_83 = arith.constant 0 : index
    %c0_84 = arith.constant 0 : index
    %214 = vector.load %arg6[%213, %c0_83, %c0_84] : memref<10x1x128xf32, #tpu.memory_space<vmem>>, vector<1x1x128xf32>
    %215 = vector.shape_cast %214 : vector<1x1x128xf32> to vector<1x128xf32>
    %cst_85 = arith.constant dense<0.000000e+00> : vector<128xf32>
    %216 = vector.multi_reduction <add>, %209, %cst_85 [0] : vector<8x128xf32> to vector<128xf32>
    %217 = vector.shape_cast %216 : vector<128xf32> to vector<1x128xf32>
    %cst_86 = arith.constant 8.000000e+00 : f32
    %218 = vector.broadcast %cst_86 : f32 to vector<1x128xf32>
    %219 = arith.divf %217, %218 : vector<1x128xf32>
    %220 = vector.broadcast %219 : vector<1x128xf32> to vector<8x128xf32>
    %221 = arith.subf %209, %220 : vector<8x128xf32>
    %222 = arith.mulf %221, %221 : vector<8x128xf32>
    %cst_87 = arith.constant dense<0.000000e+00> : vector<128xf32>
    %223 = vector.multi_reduction <add>, %222, %cst_87 [0] : vector<8x128xf32> to vector<128xf32>
    %224 = vector.shape_cast %223 : vector<128xf32> to vector<1x128xf32>
    %cst_88 = arith.constant 8.000000e+00 : f32
    %225 = vector.broadcast %cst_88 : f32 to vector<1x128xf32>
    %226 = arith.divf %224, %225 : vector<1x128xf32>
    %cst_89 = arith.constant 9.99999974E-6 : f32
    %227 = vector.broadcast %cst_89 : f32 to vector<1x128xf32>
    %228 = arith.addf %226, %227 : vector<1x128xf32>
    %229 = math.rsqrt %228 : vector<1x128xf32>
    %230 = arith.mulf %212, %229 : vector<1x128xf32>
    %231 = vector.broadcast %230 : vector<1x128xf32> to vector<8x128xf32>
    %232 = arith.mulf %221, %231 : vector<8x128xf32>
    %233 = vector.broadcast %215 : vector<1x128xf32> to vector<8x128xf32>
    %234 = arith.addf %232, %233 : vector<8x128xf32>
    %235 = arith.negf %234 : vector<8x128xf32>
    %236 = math.exp %235 : vector<8x128xf32>
    %cst_90 = arith.constant 1.000000e+00 : f32
    %237 = vector.broadcast %cst_90 : f32 to vector<8x128xf32>
    %238 = arith.addf %237, %236 : vector<8x128xf32>
    %239 = arith.divf %237, %238 : vector<8x128xf32>
    %240 = arith.truncf %239 : vector<8x128xf32> to vector<8x128xbf16>
    %c6_i32 = arith.constant 6 : i32
    %241 = arith.index_cast %c6_i32 : i32 to index
    %c0_91 = arith.constant 0 : index
    %c0_92 = arith.constant 0 : index
    %242 = vector.load %arg4[%241, %c0_91, %c0_92] : memref<10x128x128xbf16, #tpu.memory_space<vmem>>, vector<1x128x128xbf16>
    %243 = vector.shape_cast %242 : vector<1x128x128xbf16> to vector<128x128xbf16>
    %cst_93 = arith.constant dense<0.000000e+00> : vector<8x128xf32>
    %244 = tpu.matmul %240, %243, %cst_93 {dimension_numbers = #tpu.dot_dimension_numbers<[1], [0], [0], [1], [0, 0, 1, 1], [], []>} : vector<8x128xbf16>, vector<128x128xbf16>, vector<8x128xf32> -> vector<8x128xf32>
    %245 = arith.index_cast %c6_i32 : i32 to index
    %c0_94 = arith.constant 0 : index
    %c0_95 = arith.constant 0 : index
    %246 = vector.load %arg5[%245, %c0_94, %c0_95] : memref<10x1x128xf32, #tpu.memory_space<vmem>>, vector<1x1x128xf32>
    %247 = vector.shape_cast %246 : vector<1x1x128xf32> to vector<1x128xf32>
    %248 = arith.index_cast %c6_i32 : i32 to index
    %c0_96 = arith.constant 0 : index
    %c0_97 = arith.constant 0 : index
    %249 = vector.load %arg6[%248, %c0_96, %c0_97] : memref<10x1x128xf32, #tpu.memory_space<vmem>>, vector<1x1x128xf32>
    %250 = vector.shape_cast %249 : vector<1x1x128xf32> to vector<1x128xf32>
    %cst_98 = arith.constant dense<0.000000e+00> : vector<128xf32>
    %251 = vector.multi_reduction <add>, %244, %cst_98 [0] : vector<8x128xf32> to vector<128xf32>
    %252 = vector.shape_cast %251 : vector<128xf32> to vector<1x128xf32>
    %cst_99 = arith.constant 8.000000e+00 : f32
    %253 = vector.broadcast %cst_99 : f32 to vector<1x128xf32>
    %254 = arith.divf %252, %253 : vector<1x128xf32>
    %255 = vector.broadcast %254 : vector<1x128xf32> to vector<8x128xf32>
    %256 = arith.subf %244, %255 : vector<8x128xf32>
    %257 = arith.mulf %256, %256 : vector<8x128xf32>
    %cst_100 = arith.constant dense<0.000000e+00> : vector<128xf32>
    %258 = vector.multi_reduction <add>, %257, %cst_100 [0] : vector<8x128xf32> to vector<128xf32>
    %259 = vector.shape_cast %258 : vector<128xf32> to vector<1x128xf32>
    %cst_101 = arith.constant 8.000000e+00 : f32
    %260 = vector.broadcast %cst_101 : f32 to vector<1x128xf32>
    %261 = arith.divf %259, %260 : vector<1x128xf32>
    %cst_102 = arith.constant 9.99999974E-6 : f32
    %262 = vector.broadcast %cst_102 : f32 to vector<1x128xf32>
    %263 = arith.addf %261, %262 : vector<1x128xf32>
    %264 = math.rsqrt %263 : vector<1x128xf32>
    %265 = arith.mulf %247, %264 : vector<1x128xf32>
    %266 = vector.broadcast %265 : vector<1x128xf32> to vector<8x128xf32>
    %267 = arith.mulf %256, %266 : vector<8x128xf32>
    %268 = vector.broadcast %250 : vector<1x128xf32> to vector<8x128xf32>
    %269 = arith.addf %267, %268 : vector<8x128xf32>
    %270 = arith.negf %269 : vector<8x128xf32>
    %271 = math.exp %270 : vector<8x128xf32>
    %cst_103 = arith.constant 1.000000e+00 : f32
    %272 = vector.broadcast %cst_103 : f32 to vector<8x128xf32>
    %273 = arith.addf %272, %271 : vector<8x128xf32>
    %274 = arith.divf %272, %273 : vector<8x128xf32>
    %275 = arith.truncf %274 : vector<8x128xf32> to vector<8x128xbf16>
    %c7_i32 = arith.constant 7 : i32
    %276 = arith.index_cast %c7_i32 : i32 to index
    %c0_104 = arith.constant 0 : index
    %c0_105 = arith.constant 0 : index
    %277 = vector.load %arg4[%276, %c0_104, %c0_105] : memref<10x128x128xbf16, #tpu.memory_space<vmem>>, vector<1x128x128xbf16>
    %278 = vector.shape_cast %277 : vector<1x128x128xbf16> to vector<128x128xbf16>
    %cst_106 = arith.constant dense<0.000000e+00> : vector<8x128xf32>
    %279 = tpu.matmul %275, %278, %cst_106 {dimension_numbers = #tpu.dot_dimension_numbers<[1], [0], [0], [1], [0, 0, 1, 1], [], []>} : vector<8x128xbf16>, vector<128x128xbf16>, vector<8x128xf32> -> vector<8x128xf32>
    %280 = arith.index_cast %c7_i32 : i32 to index
    %c0_107 = arith.constant 0 : index
    %c0_108 = arith.constant 0 : index
    %281 = vector.load %arg5[%280, %c0_107, %c0_108] : memref<10x1x128xf32, #tpu.memory_space<vmem>>, vector<1x1x128xf32>
    %282 = vector.shape_cast %281 : vector<1x1x128xf32> to vector<1x128xf32>
    %283 = arith.index_cast %c7_i32 : i32 to index
    %c0_109 = arith.constant 0 : index
    %c0_110 = arith.constant 0 : index
    %284 = vector.load %arg6[%283, %c0_109, %c0_110] : memref<10x1x128xf32, #tpu.memory_space<vmem>>, vector<1x1x128xf32>
    %285 = vector.shape_cast %284 : vector<1x1x128xf32> to vector<1x128xf32>
    %cst_111 = arith.constant dense<0.000000e+00> : vector<128xf32>
    %286 = vector.multi_reduction <add>, %279, %cst_111 [0] : vector<8x128xf32> to vector<128xf32>
    %287 = vector.shape_cast %286 : vector<128xf32> to vector<1x128xf32>
    %cst_112 = arith.constant 8.000000e+00 : f32
    %288 = vector.broadcast %cst_112 : f32 to vector<1x128xf32>
    %289 = arith.divf %287, %288 : vector<1x128xf32>
    %290 = vector.broadcast %289 : vector<1x128xf32> to vector<8x128xf32>
    %291 = arith.subf %279, %290 : vector<8x128xf32>
    %292 = arith.mulf %291, %291 : vector<8x128xf32>
    %cst_113 = arith.constant dense<0.000000e+00> : vector<128xf32>
    %293 = vector.multi_reduction <add>, %292, %cst_113 [0] : vector<8x128xf32> to vector<128xf32>
    %294 = vector.shape_cast %293 : vector<128xf32> to vector<1x128xf32>
    %cst_114 = arith.constant 8.000000e+00 : f32
    %295 = vector.broadcast %cst_114 : f32 to vector<1x128xf32>
    %296 = arith.divf %294, %295 : vector<1x128xf32>
    %cst_115 = arith.constant 9.99999974E-6 : f32
    %297 = vector.broadcast %cst_115 : f32 to vector<1x128xf32>
    %298 = arith.addf %296, %297 : vector<1x128xf32>
    %299 = math.rsqrt %298 : vector<1x128xf32>
    %300 = arith.mulf %282, %299 : vector<1x128xf32>
    %301 = vector.broadcast %300 : vector<1x128xf32> to vector<8x128xf32>
    %302 = arith.mulf %291, %301 : vector<8x128xf32>
    %303 = vector.broadcast %285 : vector<1x128xf32> to vector<8x128xf32>
    %304 = arith.addf %302, %303 : vector<8x128xf32>
    %305 = arith.negf %304 : vector<8x128xf32>
    %306 = math.exp %305 : vector<8x128xf32>
    %cst_116 = arith.constant 1.000000e+00 : f32
    %307 = vector.broadcast %cst_116 : f32 to vector<8x128xf32>
    %308 = arith.addf %307, %306 : vector<8x128xf32>
    %309 = arith.divf %307, %308 : vector<8x128xf32>
    %310 = arith.truncf %309 : vector<8x128xf32> to vector<8x128xbf16>
    %c8_i32 = arith.constant 8 : i32
    %311 = arith.index_cast %c8_i32 : i32 to index
    %c0_117 = arith.constant 0 : index
    %c0_118 = arith.constant 0 : index
    %312 = vector.load %arg4[%311, %c0_117, %c0_118] : memref<10x128x128xbf16, #tpu.memory_space<vmem>>, vector<1x128x128xbf16>
    %313 = vector.shape_cast %312 : vector<1x128x128xbf16> to vector<128x128xbf16>
    %cst_119 = arith.constant dense<0.000000e+00> : vector<8x128xf32>
    %314 = tpu.matmul %310, %313, %cst_119 {dimension_numbers = #tpu.dot_dimension_numbers<[1], [0], [0], [1], [0, 0, 1, 1], [], []>} : vector<8x128xbf16>, vector<128x128xbf16>, vector<8x128xf32> -> vector<8x128xf32>
    %315 = arith.index_cast %c8_i32 : i32 to index
    %c0_120 = arith.constant 0 : index
    %c0_121 = arith.constant 0 : index
    %316 = vector.load %arg5[%315, %c0_120, %c0_121] : memref<10x1x128xf32, #tpu.memory_space<vmem>>, vector<1x1x128xf32>
    %317 = vector.shape_cast %316 : vector<1x1x128xf32> to vector<1x128xf32>
    %318 = arith.index_cast %c8_i32 : i32 to index
    %c0_122 = arith.constant 0 : index
    %c0_123 = arith.constant 0 : index
    %319 = vector.load %arg6[%318, %c0_122, %c0_123] : memref<10x1x128xf32, #tpu.memory_space<vmem>>, vector<1x1x128xf32>
    %320 = vector.shape_cast %319 : vector<1x1x128xf32> to vector<1x128xf32>
    %cst_124 = arith.constant dense<0.000000e+00> : vector<128xf32>
    %321 = vector.multi_reduction <add>, %314, %cst_124 [0] : vector<8x128xf32> to vector<128xf32>
    %322 = vector.shape_cast %321 : vector<128xf32> to vector<1x128xf32>
    %cst_125 = arith.constant 8.000000e+00 : f32
    %323 = vector.broadcast %cst_125 : f32 to vector<1x128xf32>
    %324 = arith.divf %322, %323 : vector<1x128xf32>
    %325 = vector.broadcast %324 : vector<1x128xf32> to vector<8x128xf32>
    %326 = arith.subf %314, %325 : vector<8x128xf32>
    %327 = arith.mulf %326, %326 : vector<8x128xf32>
    %cst_126 = arith.constant dense<0.000000e+00> : vector<128xf32>
    %328 = vector.multi_reduction <add>, %327, %cst_126 [0] : vector<8x128xf32> to vector<128xf32>
    %329 = vector.shape_cast %328 : vector<128xf32> to vector<1x128xf32>
    %cst_127 = arith.constant 8.000000e+00 : f32
    %330 = vector.broadcast %cst_127 : f32 to vector<1x128xf32>
    %331 = arith.divf %329, %330 : vector<1x128xf32>
    %cst_128 = arith.constant 9.99999974E-6 : f32
    %332 = vector.broadcast %cst_128 : f32 to vector<1x128xf32>
    %333 = arith.addf %331, %332 : vector<1x128xf32>
    %334 = math.rsqrt %333 : vector<1x128xf32>
    %335 = arith.mulf %317, %334 : vector<1x128xf32>
    %336 = vector.broadcast %335 : vector<1x128xf32> to vector<8x128xf32>
    %337 = arith.mulf %326, %336 : vector<8x128xf32>
    %338 = vector.broadcast %320 : vector<1x128xf32> to vector<8x128xf32>
    %339 = arith.addf %337, %338 : vector<8x128xf32>
    %340 = arith.negf %339 : vector<8x128xf32>
    %341 = math.exp %340 : vector<8x128xf32>
    %cst_129 = arith.constant 1.000000e+00 : f32
    %342 = vector.broadcast %cst_129 : f32 to vector<8x128xf32>
    %343 = arith.addf %342, %341 : vector<8x128xf32>
    %344 = arith.divf %342, %343 : vector<8x128xf32>
    %345 = arith.truncf %344 : vector<8x128xf32> to vector<8x128xbf16>
    %c9_i32 = arith.constant 9 : i32
    %346 = arith.index_cast %c9_i32 : i32 to index
    %c0_130 = arith.constant 0 : index
    %c0_131 = arith.constant 0 : index
    %347 = vector.load %arg4[%346, %c0_130, %c0_131] : memref<10x128x128xbf16, #tpu.memory_space<vmem>>, vector<1x128x128xbf16>
    %348 = vector.shape_cast %347 : vector<1x128x128xbf16> to vector<128x128xbf16>
    %cst_132 = arith.constant dense<0.000000e+00> : vector<8x128xf32>
    %349 = tpu.matmul %345, %348, %cst_132 {dimension_numbers = #tpu.dot_dimension_numbers<[1], [0], [0], [1], [0, 0, 1, 1], [], []>} : vector<8x128xbf16>, vector<128x128xbf16>, vector<8x128xf32> -> vector<8x128xf32>
    %350 = arith.index_cast %c9_i32 : i32 to index
    %c0_133 = arith.constant 0 : index
    %c0_134 = arith.constant 0 : index
    %351 = vector.load %arg5[%350, %c0_133, %c0_134] : memref<10x1x128xf32, #tpu.memory_space<vmem>>, vector<1x1x128xf32>
    %352 = vector.shape_cast %351 : vector<1x1x128xf32> to vector<1x128xf32>
    %353 = arith.index_cast %c9_i32 : i32 to index
    %c0_135 = arith.constant 0 : index
    %c0_136 = arith.constant 0 : index
    %354 = vector.load %arg6[%353, %c0_135, %c0_136] : memref<10x1x128xf32, #tpu.memory_space<vmem>>, vector<1x1x128xf32>
    %355 = vector.shape_cast %354 : vector<1x1x128xf32> to vector<1x128xf32>
    %cst_137 = arith.constant dense<0.000000e+00> : vector<128xf32>
    %356 = vector.multi_reduction <add>, %349, %cst_137 [0] : vector<8x128xf32> to vector<128xf32>
    %357 = vector.shape_cast %356 : vector<128xf32> to vector<1x128xf32>
    %cst_138 = arith.constant 8.000000e+00 : f32
    %358 = vector.broadcast %cst_138 : f32 to vector<1x128xf32>
    %359 = arith.divf %357, %358 : vector<1x128xf32>
    %360 = vector.broadcast %359 : vector<1x128xf32> to vector<8x128xf32>
    %361 = arith.subf %349, %360 : vector<8x128xf32>
    %362 = arith.mulf %361, %361 : vector<8x128xf32>
    %cst_139 = arith.constant dense<0.000000e+00> : vector<128xf32>
    %363 = vector.multi_reduction <add>, %362, %cst_139 [0] : vector<8x128xf32> to vector<128xf32>
    %364 = vector.shape_cast %363 : vector<128xf32> to vector<1x128xf32>
    %cst_140 = arith.constant 8.000000e+00 : f32
    %365 = vector.broadcast %cst_140 : f32 to vector<1x128xf32>
    %366 = arith.divf %364, %365 : vector<1x128xf32>
    %cst_141 = arith.constant 9.99999974E-6 : f32
    %367 = vector.broadcast %cst_141 : f32 to vector<1x128xf32>
    %368 = arith.addf %366, %367 : vector<1x128xf32>
    %369 = math.rsqrt %368 : vector<1x128xf32>
    %370 = arith.mulf %352, %369 : vector<1x128xf32>
    %371 = vector.broadcast %370 : vector<1x128xf32> to vector<8x128xf32>
    %372 = arith.mulf %361, %371 : vector<8x128xf32>
    %373 = vector.broadcast %355 : vector<1x128xf32> to vector<8x128xf32>
    %374 = arith.addf %372, %373 : vector<8x128xf32>
    %375 = arith.negf %374 : vector<8x128xf32>
    %376 = math.exp %375 : vector<8x128xf32>
    %cst_142 = arith.constant 1.000000e+00 : f32
    %377 = vector.broadcast %cst_142 : f32 to vector<8x128xf32>
    %378 = arith.addf %377, %376 : vector<8x128xf32>
    %379 = arith.divf %377, %378 : vector<8x128xf32>
    %380 = arith.truncf %379 : vector<8x128xf32> to vector<8x128xbf16>
    %c10_i32 = arith.constant 10 : i32
    %c0_143 = arith.constant 0 : index
    %c0_144 = arith.constant 0 : index
    %381 = vector.load %arg7[%c0_143, %c0_144] : memref<128x512xbf16, #tpu.memory_space<vmem>>, vector<128x512xbf16>
    %cst_145 = arith.constant dense<0.000000e+00> : vector<8x512xf32>
    %382 = tpu.matmul %380, %381, %cst_145 {dimension_numbers = #tpu.dot_dimension_numbers<[1], [0], [0], [1], [0, 0, 1, 1], [], []>} : vector<8x128xbf16>, vector<128x512xbf16>, vector<8x512xf32> -> vector<8x512xf32>
    %c0_146 = arith.constant 0 : index
    %c0_147 = arith.constant 0 : index
    %383 = vector.load %arg8[%c0_146, %c0_147] : memref<1x512xf32, #tpu.memory_space<vmem>>, vector<1x512xf32>
    %384 = vector.broadcast %383 : vector<1x512xf32> to vector<8x512xf32>
    %385 = arith.addf %382, %384 : vector<8x512xf32>
    %386 = arith.negf %385 : vector<8x512xf32>
    %387 = math.exp %386 : vector<8x512xf32>
    %cst_148 = arith.constant 1.000000e+00 : f32
    %388 = vector.broadcast %cst_148 : f32 to vector<8x512xf32>
    %389 = arith.addf %388, %387 : vector<8x512xf32>
    %390 = arith.divf %388, %389 : vector<8x512xf32>
    %c0_149 = arith.constant 0 : index
    %c0_150 = arith.constant 0 : index
    %391 = vector.load %arg9[%c0_149, %c0_150] : memref<8x512xf32, #tpu.memory_space<vmem>>, vector<8x512xf32>
    tpu.vector_store %arg9[%c0_149, %c0_150], %390 {strides = array<i32>} : memref<8x512xf32, #tpu.memory_space<vmem>>, vector<8x512xf32>,
    return
  }
}

</mosaic_0001>

<bundles_post_ra>
// kernel: tpu_custom_call.1
= control target key start
LH: loop header
LB: loop body
LE: loop exit
PB: predicated region body
PF: predicated region fallthrough
CT: control target
= control target key end

     0   :  { %14 = vsyncpa [#allocation3], 0  ;;  %s3287_s0 = inlined_call_operand.hbm [shape: f32[8,256], index: 0, kind: input, shape index: {}]   ;;  %s3288_s1 = inlined_call_operand.hbm [shape: bf16[256,128], index: 1, kind: input, shape index: {}]   ;;  %s3289_s2 = inlined_call_operand.vmem [shape: f32[1,128], index: 2, kind: input, shape index: {}]   ;;  %s3290_s3 = inlined_call_operand.vmem [shape: f32[1,128], index: 3, kind: input, shape index: {}]   ;;  %s3291_s4 = inlined_call_operand.hbm [shape: bf16[10,128,128], index: 4, kind: input, shape index: {}]   ;;  %s3292_s5 = inlined_call_operand.vmem [shape: f32[10,1,128], index: 5, kind: input, shape index: {}]   ;;  %s3293_s6 = inlined_call_operand.vmem [shape: f32[10,1,128], index: 6, kind: input, shape index: {}]   ;;  %s3294_s7 = inlined_call_operand.hbm [shape: bf16[128,512], index: 7, kind: input, shape index: {}]   ;;  %s3295_s8 = inlined_call_operand.vmem [shape: f32[1,512], index: 8, kind: input, shape index: {}]   ;;  %s3296_s9 = inlined_call_operand.hbm [shape: f32[8,512], index: 9, kind: output, shape index: {}]  }
   0x1   :  { %15 = vsyncpa [#allocation6], 0 }
   0x2   :  { %16 = vsyncpa [#allocation9], 0 }
   0x3   :  { %17 = vsyncpa [#allocation4], 0  ;;  %s2970_s30 = smov [#allocation5]   ;;  %s2852_s13 = scalar_lea.hbm %s3288_s1, 2048 }
   0x4   :  { %s33_s10 = sshll.u32 %s2970_s30, 4  ;;  %p2853_p0 = scmp.ne.s32.totalorder %s3288_s1, %s2852_s13  ;;  %s34_s10 = int_to_ptr.vmem [resolvable:$true] %s33_s10 }
   0x5   :  { %p2856_p1 = scmp.lt.u32.totalorder %s2852_s13, %s3288_s1 }
   0x7   :  { %p2858_p2 = pnand %p2856_p1, %p2853_p0 }
   0x9   :  { %2861 = shalt.err (!%p2858_p2)
}
   0xa   :  { %s2862_s18 = scalar_lea.vmem %s34_s10, 2048  ;;  %p2867_p4 = scmp.lt.s32.totalorder %s34_s10, %s34_s10 }
   0xb   :  { %p2863_p3 = scmp.ne.s32.totalorder %s34_s10, %s2862_s18  ;;  %p2868_p5 = scmp.lt.s32.totalorder %s2862_s18, %s2862_s18 }
   0xd   :  { %p2869_p6 = por %p2868_p5, %p2867_p4 }
   0xf   :  { %p2870_p7 = pnand %p2869_p6, %p2863_p3 }
  0x11   :  { %2873 = shalt.err (!%p2870_p7)
}
  0x12   :  { %s2971_s19 = smov 64   ;;  %s2972_s20 = smov 4  }
  0x13   :  { %39 = dma.hbm_to_vmem [thread:$0]  %s3288_s1, 2048, %s34_s10, [#allocation6], %s2971_s19, %s2971_s19, %s2972_s20  }
  0x14   :  { %s2973_s23 = smov [#allocation2]   ;;  %s2974_s25 = smov [#allocation7]  }
  0x15   :  { %s24_s24 = sshll.u32 %s2973_s23, 4  ;;  %s49_s26 = sshll.u32 %s2974_s25, 4  ;;  %s25_s24 = int_to_ptr.vmem [resolvable:$true] %s24_s24  ;;  %s50_s26 = int_to_ptr.vmem [resolvable:$true] %s49_s26 }
  0x16   :  { %s2874_s29 = scalar_lea.hbm %s3287_s0, 256 }
  0x17   :  { %p2875_p8 = scmp.ne.s32.totalorder %s3287_s0, %s2874_s29  ;;  %p2878_p9 = scmp.lt.u32.totalorder %s2874_s29, %s3287_s0 }
  0x19   :  { %p2880_p10 = pnand %p2878_p9, %p2875_p8 }
  0x1b   :  { %2883 = shalt.err (!%p2880_p10)
}
  0x1c   :  { %s2884_s1 = scalar_lea.vmem %s25_s24, 256  ;;  %p2889_p12 = scmp.lt.s32.totalorder %s25_s24, %s25_s24 }
  0x1d   :  { %p2885_p11 = scmp.ne.s32.totalorder %s25_s24, %s2884_s1  ;;  %p2890_p13 = scmp.lt.s32.totalorder %s2884_s1, %s2884_s1 }
  0x1f   :  { %p2891_p0 = por %p2890_p13, %p2889_p12 }
  0x21   :  { %p2892_p1 = pnand %p2891_p0, %p2885_p11 }
  0x23   :  { %2895 = shalt.err (!%p2892_p1)
}
  0x24   :  { %27 = dma.hbm_to_vmem [thread:$0]  %s3287_s0, 256, %s25_s24, [#allocation3]  }
  0x25   :  { %s2896_s17 = scalar_lea.hbm %s3291_s4, 10240 }
  0x26   :  { %p2897_p2 = scmp.ne.s32.totalorder %s3291_s4, %s2896_s17  ;;  %p2900_p3 = scmp.lt.u32.totalorder %s2896_s17, %s3291_s4 }
  0x28   :  { %p2902_p4 = pnand %p2900_p3, %p2897_p2 }
  0x2a   :  { %2905 = shalt.err (!%p2902_p4)
}
  0x2b   :  { %s2906_s25 = scalar_lea.vmem %s50_s26, 10240  ;;  %p2911_p6 = scmp.lt.s32.totalorder %s50_s26, %s50_s26 }
  0x2c   :  { %p2907_p5 = scmp.ne.s32.totalorder %s50_s26, %s2906_s25  ;;  %p2912_p7 = scmp.lt.s32.totalorder %s2906_s25, %s2906_s25 }
  0x2e   :  { %p2913_p8 = por %p2912_p7, %p2911_p6 }
  0x30   :  { %p2914_p9 = pnand %p2913_p8, %p2907_p5 }
  0x32   :  { %2917 = shalt.err (!%p2914_p9)
}
  0x33   :  { %55 = dma.hbm_to_vmem [thread:$0]  %s3291_s4, 10240, %s50_s26, [#allocation6], %s2971_s19, %s2971_s19, %s2972_s20  }
  0x34   :  { %s2975_s27 = smov [#allocation8]   ;;  %s2918_s11 = scalar_lea.hbm %s3294_s7, 4096 }
  0x35   :  { %s65_s28 = sshll.u32 %s2975_s27, 4  ;;  %p2919_p10 = scmp.ne.s32.totalorder %s3294_s7, %s2918_s11  ;;  %s66_s28 = int_to_ptr.vmem [resolvable:$true] %s65_s28 }
  0x36   :  { %p2922_p11 = scmp.lt.u32.totalorder %s2918_s11, %s3294_s7 }
  0x38   :  { %p2924_p12 = pnand %p2922_p11, %p2919_p10 }
  0x3a   :  { %2927 = shalt.err (!%p2924_p12)
}
  0x3b   :  { %s2928_s14 = scalar_lea.vmem %s66_s28, 4096  ;;  %p2933_p0 = scmp.lt.s32.totalorder %s66_s28, %s66_s28 }
  0x3c   :  { %p2929_p13 = scmp.ne.s32.totalorder %s66_s28, %s2928_s14  ;;  %p2934_p1 = scmp.lt.s32.totalorder %s2928_s14, %s2928_s14 }
  0x3e   :  { %p2935_p2 = por %p2934_p1, %p2933_p0 }
  0x40   :  { %p2936_p3 = pnand %p2935_p2, %p2929_p13 }
  0x42   :  { %2939 = shalt.err (!%p2936_p3)
}
  0x43   :  { %s2976_s4 = smov 256   ;;  %s2977_s19 = smov 16  }
  0x44   :  { %71 = dma.hbm_to_vmem [thread:$0]  %s3294_s7, 4096, %s66_s28, [#allocation9], %s2976_s4, %s2976_s4, %s2977_s19  }
  0x45   :  { %2962 = dma.done.wait [#allocation3], 256  }
  0x46   :  { %2963 = vsyncadd [#allocation3], 4294967040 }
  0x47   :  { %2964 = dma.done.wait [#allocation6], 12288  }
  0x48   :  { %2965 = vsyncadd [#allocation6], 4294955008 }
  0x49   :  { %2966 = dma.done.wait [#allocation9], 4096  }
  0x4a   :  { %2967 = vsyncadd [#allocation9], 4294963200  ;;  %v2626_v0 = vld [vmem:[#allocation5 + $0x40] sm:$0xff]   ;;  %v2628_v2 = vld [vmem:[#allocation5 + $0x48] sm:$0xff]   ;;  %v2978_v21 = vmov 0.0   ;;  %vm2979_vm0 = vmmov 0   ;;  %v282_v51 = vlaneseq }
  0x4b   :  { %v2627_v1 = vld [vmem:[#allocation5] sm:$0xff]   ;;  %2302 = vmatprep.subr.bf16.mxu0 %v2626_v0  ;;  %v2629_v3 = vld [vmem:[#allocation5 + $0x8] sm:$0xff]   ;;  %v2630_v4 = vld [vmem:[#allocation5 + $0x50] sm:$0xff]   ;;  %2414 = vmatprep.subr.bf16.mxu1 %v2978_v21 }
  0x4c   :  { %2303 = vmatpush3.bf16.msra.mxu0 %v2627_v1  ;;  %v2631_v5 = vld [vmem:[#allocation5 + $0x10] sm:$0xff]   ;;  %v2632_v6 = vld [vmem:[#allocation5 + $0x58] sm:$0xff]   ;;  %v2634_v8 = vld [vmem:[#allocation5 + $0x60] sm:$0xff]   ;;  %2430 = vmatprep.mubr.msk.bf16.mxu1 %vm2979_vm0, %v2978_v21  ;;  %v3100_v52 = vshrl.u32 %v282_v51, 7 }
  0x4d   :  { %2304 = vmatprep.subr.bf16.mxu0 %v2628_v2  ;;  %v2633_v7 = vld [vmem:[#allocation5 + $0x18] sm:$0xff]   ;;  %v2635_v9 = vld [vmem:[#allocation5 + $0x20] sm:$0xff]   ;;  %v2636_v10 = vld [vmem:[#allocation5 + $0x68] sm:$0xff]  }
  0x4e   :  { %v88_v11 = vld [vmem:[#allocation2 + $0x8] sm:$0xff]  ;;  %v2637_v12 = vld [vmem:[#allocation5 + $0x28] sm:$0xff]   ;;  %v2638_v14 = vld [vmem:[#allocation5 + $0x70] sm:$0xff]   ;;  %v3106_v54 = vsub.s32 0, %v3100_v52 }
  0x4f   :  { %v90_v13 = vpack.c.bf16 %v88_v11, %v88_v11  ;;  %v2639_v15 = vld [vmem:[#allocation5 + $0x30] sm:$0xff]   ;;  %v2640_v16 = vld [vmem:[#allocation5 + $0x78] sm:$0xff]   ;;  %v2642_v20 = vld [vmem:[#allocation7] sm:$0xff]  }
  0x50   :  { %2305 = vmatpush3.bf16.msra.mxu0 %v2629_v3  ;;  %v2641_v17 = vld [vmem:[#allocation5 + $0x38] sm:$0xff]   ;;  %v87_v18 = vld [vmem:[#allocation2] sm:$0xff]  ;;  %2415 = vmatpush3.bf16.msra.mxu1 %v2642_v20  ;;  %v2643_v22 = vld [vmem:[#allocation7 + $0x8] sm:$0xff]  }
  0x51   :  { %2306 = vmatprep.subr.bf16.mxu0 %v2630_v4  ;;  %251 = vmatprep.mubr.bf16.mxu0 %v90_v13  ;;  %v89_v19 = vpack.c.bf16 %v87_v18, %v87_v18  ;;  %v2644_v23 = vld [vmem:[#allocation7 + $0x10] sm:$0xff]   ;;  %v2645_v24 = vld [vmem:[#allocation7 + $0x18] sm:$0xff]   ;;  %v2646_v25 = vld [vmem:[#allocation7 + $0x20] sm:$0xff]  }
  0x52   :  { %2416 = vmatprep.subr.bf16.mxu1 %v2978_v21  ;;  %v2647_v26 = vld [vmem:[#allocation7 + $0x28] sm:$0xff]   ;;  %v2648_v27 = vld [vmem:[#allocation7 + $0x30] sm:$0xff]   ;;  %v2649_v28 = vld [vmem:[#allocation7 + $0x38] sm:$0xff]  }
  0x53   :  { %v259_v53 = vld [vmem:[%s3289_s2] sm:$0x1]  ;;  %v2650_v2 = vld [vmem:[#allocation7 + $0x40] sm:$0xff]   ;;  %v2651_v3 = vld [vmem:[#allocation7 + $0x48] sm:$0xff]  }
  0x54   :  { %2307 = vmatpush3.bf16.msra.mxu0 %v2631_v5  ;;  %2417 = vmatpush3.bf16.msra.mxu1 %v2643_v22  ;;  %v2146_v58 = vld [vmem:[%s3290_s3] ss:$0 sm:$0xff]  ;;  %v2653_v5 = vld [vmem:[#allocation7 + $0x58] sm:$0xff]  }
  0x55   :  { %2308 = vmatprep.subr.bf16.mxu0 %v2632_v6  ;;  %2418 = vmatprep.subr.bf16.mxu1 %v2978_v21  ;;  %v2652_v4 = vld [vmem:[#allocation7 + $0x50] sm:$0xff]   ;;  %v2654_v6 = vld [vmem:[#allocation7 + $0x60] sm:$0xff]   ;;  %v2665_v51 = vld [vmem:[#allocation7 + $0xb8] sm:$0xff]  }
  0x58   :  { %2309 = vmatpush3.bf16.msra.mxu0 %v2633_v7  ;;  %2419 = vmatpush3.bf16.msra.mxu1 %v2644_v23  ;;  %v2655_v7 = vld [vmem:[#allocation7 + $0x68] sm:$0xff]  }
  0x59   :  { %2310 = vmatprep.subr.bf16.mxu0 %v2634_v8  ;;  %2420 = vmatprep.subr.bf16.mxu1 %v2978_v21  ;;  %v2656_v8 = vld [vmem:[#allocation7 + $0x70] sm:$0xff]  }
  0x5c   :  { %2311 = vmatpush3.bf16.msra.mxu0 %v2635_v9  ;;  %2421 = vmatpush3.bf16.msra.mxu1 %v2645_v24  ;;  %v2657_v9 = vld [vmem:[#allocation7 + $0x78] sm:$0xff]  }
  0x5d   :  { %2312 = vmatprep.subr.bf16.mxu0 %v2636_v10  ;;  %2422 = vmatprep.subr.bf16.mxu1 %v2978_v21 }
  0x60   :  { %2313 = vmatpush3.bf16.msra.mxu0 %v2637_v12  ;;  %2423 = vmatpush3.bf16.msra.mxu1 %v2646_v25 }
  0x61   :  { %2314 = vmatprep.subr.bf16.mxu0 %v2638_v14  ;;  %2424 = vmatprep.subr.bf16.mxu1 %v2978_v21 }
  0x64   :  { %2315 = vmatpush3.bf16.msra.mxu0 %v2639_v15  ;;  %2425 = vmatpush3.bf16.msra.mxu1 %v2647_v26 }
  0x65   :  { %2316 = vmatprep.subr.bf16.mxu0 %v2640_v16  ;;  %2426 = vmatprep.subr.bf16.mxu1 %v2978_v21 }
  0x68   :  { %2317 = vmatpush3.bf16.msra.mxu0 %v2641_v17  ;;  %2427 = vmatpush3.bf16.msra.mxu1 %v2648_v27 }
  0x69   :  { %2434 = vmatprep.subr.bf16.mxu0 %v2978_v21  ;;  %2428 = vmatprep.subr.bf16.mxu1 %v2978_v21 }
  0x6b   :  { %252 = vmatmul.mubr.bf16.vlgmr.msra.gmra.mrb[0].mxu0 %v89_v19 }
  0x6c   :  { %2450 = vmatprep.mubr.msk.bf16.mxu0 %vm2979_vm0, %v2978_v21  ;;  %2429 = vmatpush3.bf16.msra.mxu1 %v2649_v28 }
  0x6d   :  { %2454 = vmatprep.subr.bf16.mxu1 %v2978_v21  ;;  %2435 = vmatpush3.bf16.msra.mxu0 %v2650_v2 }
  0x6e   :  { %2436 = vmatprep.subr.bf16.mxu0 %v2978_v21 }
  0x71   :  { %2437 = vmatpush3.bf16.msra.mxu0 %v2651_v3 }
  0x72   :  { %2438 = vmatprep.subr.bf16.mxu0 %v2978_v21 }
  0x75   :  { %2439 = vmatpush3.bf16.msra.mxu0 %v2652_v4 }
  0x76   :  { %2440 = vmatprep.subr.bf16.mxu0 %v2978_v21 }
  0x79   :  { %2441 = vmatpush3.bf16.msra.mxu0 %v2653_v5 }
  0x7a   :  { %2442 = vmatprep.subr.bf16.mxu0 %v2978_v21 }
  0x7d   :  { %2443 = vmatpush3.bf16.msra.mxu0 %v2654_v6 }
  0x7e   :  { %2444 = vmatprep.subr.bf16.mxu0 %v2978_v21 }
  0x81   :  { %2445 = vmatpush3.bf16.msra.mxu0 %v2655_v7 }
  0x82   :  { %2446 = vmatprep.subr.bf16.mxu0 %v2978_v21 }
  0x85   :  { %2447 = vmatpush3.bf16.msra.mxu0 %v2656_v8 }
  0x86   :  { %2448 = vmatprep.subr.bf16.mxu0 %v2978_v21 }
  0x89   :  { %2449 = vmatpush3.bf16.msra.mxu0 %v2657_v9 }
  0x8a   :  { %2474 = vmatprep.subr.bf16.mxu0 %v2978_v21 }
 0x13e   :  { %v2318_v29 = vpop.f32.mrb[0].mxu0 }
 0x13f   :  { %v2319_v30 = vpop.f32.mrb[1].mxu0 }
 0x140   :  { %v2320_v31 = vadd.f32 %v2319_v30, %v2318_v29  ;;  %v2321_v32 = vpop.f32.mrb[2].mxu0 }
 0x141   :  { %v2322_v33 = vpop.f32.mrb[3].mxu0  ;;  %v406_v32 = vld [vmem:[%s3292_s5] sm:$0x1] }
 0x142   :  { %v261_v34 = vrot.slane %v2320_v31, 4 }
 0x144   :  { %v262_v35 = vadd.f32 %v2320_v31, %v261_v34 }
 0x146   :  { %v263_v36 = vrot.slane %v262_v35, 2 }
 0x148   :  { %v264_v37 = vadd.f32 %v263_v36, %v262_v35  ;;  %v2156_v36 = vld [vmem:[%s3293_s6] ss:$0 sm:$0xff] }
 0x14a   :  { %v265_v38 = vrot.slane %v264_v37, 1 }
 0x14c   :  { %v266_v39 = vadd.f32 %v265_v38, %v264_v37 }
 0x14e   :  { %v268_v40 = vmul.f32 0.125, %v266_v39 }
 0x150   :  { %v269_v41 = vsub.f32 %v2320_v31, %v268_v40 }
 0x152   :  { %v270_v42 = vmul.f32 %v269_v41, %v269_v41 }
 0x154   :  { %v271_v43 = vrot.slane %v270_v42, 4 }
 0x156   :  { %v272_v44 = vadd.f32 %v271_v43, %v270_v42 }
 0x158   :  { %v273_v45 = vrot.slane %v272_v44, 2 }
 0x15a   :  { %v274_v46 = vadd.f32 %v273_v45, %v272_v44  ;;  %v2658_v44 = vld [vmem:[#allocation7 + $0x80] sm:$0xff]   ;;  %v2659_v45 = vld [vmem:[#allocation7 + $0x88] sm:$0xff]  }
 0x15c   :  { %v275_v47 = vrot.slane %v274_v46, 1 }
 0x15e   :  { %v276_v48 = vadd.f32 %v275_v47, %v274_v46  ;;  %v2660_v46 = vld [vmem:[#allocation7 + $0x90] sm:$0xff]   ;;  %v2661_v47 = vld [vmem:[#allocation7 + $0x98] sm:$0xff]  }
 0x160   :  { %v277_v49 = vmul.f32 0.125, %v276_v48  ;;  %v2662_v48 = vld [vmem:[#allocation7 + $0xa0] sm:$0xff]  }
 0x162   :  { %v278_v50 = vadd.f32 1e-05, %v277_v49  ;;  %v2663_v49 = vld [vmem:[#allocation7 + $0xa8] sm:$0xff]  }
 0x164   :  { %2770 = vrsqrt.f32 %v278_v50  ;;  %v2664_v50 = vld [vmem:[#allocation7 + $0xb0] sm:$0xff]  }
 0x16e   :  { %v2771_v55 = vpop.eup %2770 }
 0x16f   :  { %v280_v56 = vmul.f32 %v2771_v55, %v259_v53 }
 0x171   :  { %v285_v57 = vrot.slane %v280_v56, %v3106_v54 }
 0x173   :  { %v287_v59 = vmul.f32 %v285_v57, %v269_v41 }
 0x175   :  { %v294_v60 = vadd.f32 %v2146_v58, %v287_v59 }
 0x177   :  { %v2147_v61 = vmul.f32 -1.442695, %v294_v60 }
 0x179   :  { %2772 = vpow2.f32 %v2147_v61 }
 0x183   :  { %v2773_v62 = vpop.eup %2772 }
 0x184   :  { %v298_v63 = vadd.f32 1.0, %v2773_v62 }
 0x186   :  { %2774 = vrcp.f32 %v298_v63 }
 0x190   :  { %v2775_v0 = vpop.eup %2774 }
 0x191   :  { %v301_v1 = vpack.c.bf16 %v2775_v0, %v2775_v0 }
 0x193   :  { %2431 = vmatmul.mubr.bf16.vlgmr.msra.gmra.mrb[0].mxu1 %v301_v1 }
 0x194   :  { %2470 = vmatprep.mubr.msk.bf16.mxu1 %vm2979_vm0, %v2978_v21  ;;  %2455 = vmatpush3.bf16.msra.mxu1 %v2658_v44 }
 0x195   :  { %2456 = vmatprep.subr.bf16.mxu1 %v2978_v21 }
 0x198   :  { %2457 = vmatpush3.bf16.msra.mxu1 %v2659_v45 }
 0x199   :  { %2458 = vmatprep.subr.bf16.mxu1 %v2978_v21 }
 0x19c   :  { %2459 = vmatpush3.bf16.msra.mxu1 %v2660_v46 }
 0x19d   :  { %2460 = vmatprep.subr.bf16.mxu1 %v2978_v21 }
 0x1a0   :  { %2461 = vmatpush3.bf16.msra.mxu1 %v2661_v47 }
 0x1a1   :  { %2462 = vmatprep.subr.bf16.mxu1 %v2978_v21 }
 0x1a4   :  { %2463 = vmatpush3.bf16.msra.mxu1 %v2662_v48 }
 0x1a5   :  { %2464 = vmatprep.subr.bf16.mxu1 %v2978_v21 }
 0x1a8   :  { %2465 = vmatpush3.bf16.msra.mxu1 %v2663_v49 }
 0x1a9   :  { %2466 = vmatprep.subr.bf16.mxu1 %v2978_v21 }
 0x1ac   :  { %2467 = vmatpush3.bf16.msra.mxu1 %v2664_v50 }
 0x1ad   :  { %2468 = vmatprep.subr.bf16.mxu1 %v2978_v21 }
 0x1b0   :  { %2469 = vmatpush3.bf16.msra.mxu1 %v2665_v51 }
 0x1b1   :  { %2494 = vmatprep.subr.bf16.mxu1 %v2978_v21 }
 0x266   :  { %v400_v10 = vpop.f32.mrb[0].mxu1 }
 0x267   :  { %v408_v11 = vrot.slane %v400_v10, 4  ;;  %v2432_v12 = vpop.f32.mrb[1].mxu1 }
 0x268   :  { %v403_v13 = vpop.f32.mrb[2].mxu1 }
 0x269   :  { %v409_v14 = vadd.f32 %v408_v11, %v400_v10  ;;  %v2433_v15 = vpop.f32.mrb[3].mxu1  ;;  %v2166_v11 = vld [vmem:[%s3292_s5 + $0x1] sm:$0x1] }
 0x26a   :  { %v2168_v15 = vld [vmem:[%s3293_s6 + $0x1] ss:$0 sm:$0xff] }
 0x26b   :  { %v410_v16 = vrot.slane %v409_v14, 2 }
 0x26d   :  { %v411_v17 = vadd.f32 %v410_v16, %v409_v14 }
 0x26f   :  { %v412_v18 = vrot.slane %v411_v17, 1 }
 0x271   :  { %v413_v19 = vadd.f32 %v412_v18, %v411_v17 }
 0x273   :  { %v414_v20 = vmul.f32 0.125, %v413_v19 }
 0x275   :  { %v415_v22 = vsub.f32 %v400_v10, %v414_v20 }
 0x277   :  { %v416_v23 = vmul.f32 %v415_v22, %v415_v22 }
 0x279   :  { %v417_v24 = vrot.slane %v416_v23, 4 }
 0x27b   :  { %v418_v25 = vadd.f32 %v417_v24, %v416_v23  ;;  %v2666_v24 = vld [vmem:[#allocation7 + $0xc0] sm:$0xff]  }
 0x27d   :  { %v419_v26 = vrot.slane %v418_v25, 2 }
 0x27f   :  { %v420_v27 = vadd.f32 %v419_v26, %v418_v25  ;;  %v2667_v25 = vld [vmem:[#allocation7 + $0xc8] sm:$0xff]   ;;  %v2668_v26 = vld [vmem:[#allocation7 + $0xd0] sm:$0xff]  }
 0x281   :  { %v421_v28 = vrot.slane %v420_v27, 1 }
 0x283   :  { %v422_v29 = vadd.f32 %v421_v28, %v420_v27  ;;  %v2669_v27 = vld [vmem:[#allocation7 + $0xd8] sm:$0xff]   ;;  %v2670_v28 = vld [vmem:[#allocation7 + $0xe0] sm:$0xff]  }
 0x285   :  { %v423_v30 = vmul.f32 0.125, %v422_v29  ;;  %v2671_v29 = vld [vmem:[#allocation7 + $0xe8] sm:$0xff]  }
 0x287   :  { %v424_v31 = vadd.f32 1e-05, %v423_v30  ;;  %v2672_v30 = vld [vmem:[#allocation7 + $0xf0] sm:$0xff]  }
 0x289   :  { %2776 = vrsqrt.f32 %v424_v31  ;;  %v2673_v31 = vld [vmem:[#allocation7 + $0xf8] sm:$0xff]  }
 0x293   :  { %v2777_v33 = vpop.eup %2776 }
 0x294   :  { %v426_v34 = vmul.f32 %v2777_v33, %v406_v32 }
 0x296   :  { %v431_v35 = vrot.slane %v426_v34, %v3106_v54 }
 0x298   :  { %v433_v37 = vmul.f32 %v431_v35, %v415_v22 }
 0x29a   :  { %v440_v38 = vadd.f32 %v2156_v36, %v433_v37 }
 0x29c   :  { %v2157_v39 = vmul.f32 -1.442695, %v440_v38 }
 0x29e   :  { %2778 = vpow2.f32 %v2157_v39 }
 0x2a8   :  { %v2779_v40 = vpop.eup %2778 }
 0x2a9   :  { %v444_v41 = vadd.f32 1.0, %v2779_v40 }
 0x2ab   :  { %2780 = vrcp.f32 %v444_v41 }
 0x2b5   :  { %v2781_v42 = vpop.eup %2780 }
 0x2b6   :  { %v447_v43 = vpack.c.bf16 %v2781_v42, %v2781_v42 }
 0x2b8   :  { %2451 = vmatmul.mubr.bf16.vlgmr.msra.gmra.mrb[4].mxu0 %v447_v43 }
 0x2b9   :  { %2490 = vmatprep.mubr.msk.bf16.mxu0 %vm2979_vm0, %v2978_v21  ;;  %2475 = vmatpush3.bf16.msra.mxu0 %v2666_v24 }
 0x2ba   :  { %2476 = vmatprep.subr.bf16.mxu0 %v2978_v21 }
 0x2bd   :  { %2477 = vmatpush3.bf16.msra.mxu0 %v2667_v25 }
 0x2be   :  { %2478 = vmatprep.subr.bf16.mxu0 %v2978_v21 }
 0x2c1   :  { %2479 = vmatpush3.bf16.msra.mxu0 %v2668_v26 }
 0x2c2   :  { %2480 = vmatprep.subr.bf16.mxu0 %v2978_v21 }
 0x2c5   :  { %2481 = vmatpush3.bf16.msra.mxu0 %v2669_v27 }
 0x2c6   :  { %2482 = vmatprep.subr.bf16.mxu0 %v2978_v21 }
 0x2c9   :  { %2483 = vmatpush3.bf16.msra.mxu0 %v2670_v28 }
 0x2ca   :  { %2484 = vmatprep.subr.bf16.mxu0 %v2978_v21 }
 0x2cd   :  { %2485 = vmatpush3.bf16.msra.mxu0 %v2671_v29 }
 0x2ce   :  { %2486 = vmatprep.subr.bf16.mxu0 %v2978_v21 }
 0x2d1   :  { %2487 = vmatpush3.bf16.msra.mxu0 %v2672_v30 }
 0x2d2   :  { %2488 = vmatprep.subr.bf16.mxu0 %v2978_v21 }
 0x2d5   :  { %2489 = vmatpush3.bf16.msra.mxu0 %v2673_v31 }
 0x2d6   :  { %2514 = vmatprep.subr.bf16.mxu0 %v2978_v21 }
 0x38b   :  { %v547_v53 = vpop.f32.mrb[4].mxu0 }
 0x38c   :  { %v557_v55 = vrot.slane %v547_v53, 4  ;;  %v2452_v56 = vpop.f32.mrb[5].mxu0 }
 0x38d   :  { %v550_v57 = vpop.f32.mrb[6].mxu0 }
 0x38e   :  { %v558_v58 = vadd.f32 %v557_v55, %v547_v53  ;;  %v2453_v59 = vpop.f32.mrb[7].mxu0  ;;  %v2178_v55 = vld [vmem:[%s3292_s5 + $0x2] sm:$0x1] }
 0x38f   :  { %v2180_v59 = vld [vmem:[%s3293_s6 + $0x2] ss:$0 sm:$0xff] }
 0x390   :  { %v559_v60 = vrot.slane %v558_v58, 2 }
 0x392   :  { %v560_v61 = vadd.f32 %v559_v60, %v558_v58 }
 0x394   :  { %v561_v62 = vrot.slane %v560_v61, 1 }
 0x396   :  { %v562_v63 = vadd.f32 %v561_v62, %v560_v61 }
 0x398   :  { %v563_v0 = vmul.f32 0.125, %v562_v63 }
 0x39a   :  { %v564_v1 = vsub.f32 %v547_v53, %v563_v0 }
 0x39c   :  { %v565_v2 = vmul.f32 %v564_v1, %v564_v1 }
 0x39e   :  { %v566_v3 = vrot.slane %v565_v2, 4 }
 0x3a0   :  { %v567_v4 = vadd.f32 %v566_v3, %v565_v2  ;;  %v2674_v3 = vld [vmem:[#allocation7 + $0x100] sm:$0xff]  }
 0x3a2   :  { %v568_v5 = vrot.slane %v567_v4, 2 }
 0x3a4   :  { %v569_v6 = vadd.f32 %v568_v5, %v567_v4  ;;  %v2675_v4 = vld [vmem:[#allocation7 + $0x108] sm:$0xff]   ;;  %v2676_v5 = vld [vmem:[#allocation7 + $0x110] sm:$0xff]  }
 0x3a6   :  { %v570_v7 = vrot.slane %v569_v6, 1 }
 0x3a8   :  { %v571_v8 = vadd.f32 %v570_v7, %v569_v6  ;;  %v2677_v6 = vld [vmem:[#allocation7 + $0x118] sm:$0xff]   ;;  %v2678_v7 = vld [vmem:[#allocation7 + $0x120] sm:$0xff]  }
 0x3aa   :  { %v572_v9 = vmul.f32 0.125, %v571_v8  ;;  %v2679_v8 = vld [vmem:[#allocation7 + $0x128] sm:$0xff]  }
 0x3ac   :  { %v573_v10 = vadd.f32 1e-05, %v572_v9  ;;  %v2680_v9 = vld [vmem:[#allocation7 + $0x130] sm:$0xff]  }
 0x3ae   :  { %2782 = vrsqrt.f32 %v573_v10  ;;  %v2681_v10 = vld [vmem:[#allocation7 + $0x138] sm:$0xff]  }
 0x3b8   :  { %v2783_v12 = vpop.eup %2782 }
 0x3b9   :  { %v575_v13 = vmul.f32 %v2783_v12, %v2166_v11 }
 0x3bb   :  { %v580_v14 = vrot.slane %v575_v13, %v3106_v54 }
 0x3bd   :  { %v582_v16 = vmul.f32 %v580_v14, %v564_v1 }
 0x3bf   :  { %v589_v17 = vadd.f32 %v2168_v15, %v582_v16 }
 0x3c1   :  { %v2169_v18 = vmul.f32 -1.442695, %v589_v17 }
 0x3c3   :  { %2784 = vpow2.f32 %v2169_v18 }
 0x3cd   :  { %v2785_v19 = vpop.eup %2784 }
 0x3ce   :  { %v593_v20 = vadd.f32 1.0, %v2785_v19 }
 0x3d0   :  { %2786 = vrcp.f32 %v593_v20 }
 0x3da   :  { %v2787_v22 = vpop.eup %2786 }
 0x3db   :  { %v596_v23 = vpack.c.bf16 %v2787_v22, %v2787_v22 }
 0x3dd   :  { %2471 = vmatmul.mubr.bf16.vlgmr.msra.gmra.mrb[4].mxu1 %v596_v23 }
 0x3de   :  { %2510 = vmatprep.mubr.msk.bf16.mxu1 %vm2979_vm0, %v2978_v21  ;;  %2495 = vmatpush3.bf16.msra.mxu1 %v2674_v3 }
 0x3df   :  { %2496 = vmatprep.subr.bf16.mxu1 %v2978_v21 }
 0x3e2   :  { %2497 = vmatpush3.bf16.msra.mxu1 %v2675_v4 }
 0x3e3   :  { %2498 = vmatprep.subr.bf16.mxu1 %v2978_v21 }
 0x3e6   :  { %2499 = vmatpush3.bf16.msra.mxu1 %v2676_v5 }
 0x3e7   :  { %2500 = vmatprep.subr.bf16.mxu1 %v2978_v21 }
 0x3ea   :  { %2501 = vmatpush3.bf16.msra.mxu1 %v2677_v6 }
 0x3eb   :  { %2502 = vmatprep.subr.bf16.mxu1 %v2978_v21 }
 0x3ee   :  { %2503 = vmatpush3.bf16.msra.mxu1 %v2678_v7 }
 0x3ef   :  { %2504 = vmatprep.subr.bf16.mxu1 %v2978_v21 }
 0x3f2   :  { %2505 = vmatpush3.bf16.msra.mxu1 %v2679_v8 }
 0x3f3   :  { %2506 = vmatprep.subr.bf16.mxu1 %v2978_v21 }
 0x3f6   :  { %2507 = vmatpush3.bf16.msra.mxu1 %v2680_v9 }
 0x3f7   :  { %2508 = vmatprep.subr.bf16.mxu1 %v2978_v21 }
 0x3fa   :  { %2509 = vmatpush3.bf16.msra.mxu1 %v2681_v10 }
 0x3fb   :  { %2534 = vmatprep.subr.bf16.mxu1 %v2978_v21 }
 0x4b0   :  { %v696_v32 = vpop.f32.mrb[4].mxu1 }
 0x4b1   :  { %v706_v33 = vrot.slane %v696_v32, 4  ;;  %v2472_v34 = vpop.f32.mrb[5].mxu1 }
 0x4b2   :  { %v699_v35 = vpop.f32.mrb[6].mxu1 }
 0x4b3   :  { %v707_v36 = vadd.f32 %v706_v33, %v696_v32  ;;  %v2473_v37 = vpop.f32.mrb[7].mxu1  ;;  %v2190_v33 = vld [vmem:[%s3292_s5 + $0x3] sm:$0x1] }
 0x4b4   :  { %v2192_v37 = vld [vmem:[%s3293_s6 + $0x3] ss:$0 sm:$0xff] }
 0x4b5   :  { %v708_v38 = vrot.slane %v707_v36, 2 }
 0x4b7   :  { %v709_v39 = vadd.f32 %v708_v38, %v707_v36 }
 0x4b9   :  { %v710_v40 = vrot.slane %v709_v39, 1 }
 0x4bb   :  { %v711_v41 = vadd.f32 %v710_v40, %v709_v39 }
 0x4bd   :  { %v712_v42 = vmul.f32 0.125, %v711_v41 }
 0x4bf   :  { %v713_v43 = vsub.f32 %v696_v32, %v712_v42 }
 0x4c1   :  { %v714_v44 = vmul.f32 %v713_v43, %v713_v43 }
 0x4c3   :  { %v715_v45 = vrot.slane %v714_v44, 4 }
 0x4c5   :  { %v716_v46 = vadd.f32 %v715_v45, %v714_v44  ;;  %v2682_v45 = vld [vmem:[#allocation7 + $0x140] sm:$0xff]  }
 0x4c7   :  { %v717_v47 = vrot.slane %v716_v46, 2 }
 0x4c9   :  { %v718_v48 = vadd.f32 %v717_v47, %v716_v46  ;;  %v2683_v46 = vld [vmem:[#allocation7 + $0x148] sm:$0xff]   ;;  %v2684_v47 = vld [vmem:[#allocation7 + $0x150] sm:$0xff]  }
 0x4cb   :  { %v719_v49 = vrot.slane %v718_v48, 1 }
 0x4cd   :  { %v720_v50 = vadd.f32 %v719_v49, %v718_v48  ;;  %v2685_v48 = vld [vmem:[#allocation7 + $0x158] sm:$0xff]   ;;  %v2686_v49 = vld [vmem:[#allocation7 + $0x160] sm:$0xff]  }
 0x4cf   :  { %v721_v51 = vmul.f32 0.125, %v720_v50  ;;  %v2687_v50 = vld [vmem:[#allocation7 + $0x168] sm:$0xff]  }
 0x4d1   :  { %v722_v53 = vadd.f32 1e-05, %v721_v51  ;;  %v2688_v51 = vld [vmem:[#allocation7 + $0x170] sm:$0xff]  }
 0x4d3   :  { %2788 = vrsqrt.f32 %v722_v53  ;;  %v2689_v53 = vld [vmem:[#allocation7 + $0x178] sm:$0xff]  }
 0x4dd   :  { %v2789_v56 = vpop.eup %2788 }
 0x4de   :  { %v724_v57 = vmul.f32 %v2789_v56, %v2178_v55 }
 0x4e0   :  { %v729_v58 = vrot.slane %v724_v57, %v3106_v54 }
 0x4e2   :  { %v731_v60 = vmul.f32 %v729_v58, %v713_v43 }
 0x4e4   :  { %v738_v61 = vadd.f32 %v2180_v59, %v731_v60 }
 0x4e6   :  { %v2181_v62 = vmul.f32 -1.442695, %v738_v61 }
 0x4e8   :  { %2790 = vpow2.f32 %v2181_v62 }
 0x4f2   :  { %v2791_v63 = vpop.eup %2790 }
 0x4f3   :  { %v742_v0 = vadd.f32 1.0, %v2791_v63 }
 0x4f5   :  { %2792 = vrcp.f32 %v742_v0 }
 0x4ff   :  { %v2793_v1 = vpop.eup %2792 }
 0x500   :  { %v745_v2 = vpack.c.bf16 %v2793_v1, %v2793_v1 }
 0x502   :  { %2491 = vmatmul.mubr.bf16.vlgmr.msra.gmra.mrb[8].mxu0 %v745_v2 }
 0x503   :  { %2530 = vmatprep.mubr.msk.bf16.mxu0 %vm2979_vm0, %v2978_v21  ;;  %2515 = vmatpush3.bf16.msra.mxu0 %v2682_v45 }
 0x504   :  { %2516 = vmatprep.subr.bf16.mxu0 %v2978_v21 }
 0x507   :  { %2517 = vmatpush3.bf16.msra.mxu0 %v2683_v46 }
 0x508   :  { %2518 = vmatprep.subr.bf16.mxu0 %v2978_v21 }
 0x50b   :  { %2519 = vmatpush3.bf16.msra.mxu0 %v2684_v47 }
 0x50c   :  { %2520 = vmatprep.subr.bf16.mxu0 %v2978_v21 }
 0x50f   :  { %2521 = vmatpush3.bf16.msra.mxu0 %v2685_v48 }
 0x510   :  { %2522 = vmatprep.subr.bf16.mxu0 %v2978_v21 }
 0x513   :  { %2523 = vmatpush3.bf16.msra.mxu0 %v2686_v49 }
 0x514   :  { %2524 = vmatprep.subr.bf16.mxu0 %v2978_v21 }
 0x517   :  { %2525 = vmatpush3.bf16.msra.mxu0 %v2687_v50 }
 0x518   :  { %2526 = vmatprep.subr.bf16.mxu0 %v2978_v21 }
 0x51b   :  { %2527 = vmatpush3.bf16.msra.mxu0 %v2688_v51 }
 0x51c   :  { %2528 = vmatprep.subr.bf16.mxu0 %v2978_v21 }
 0x51f   :  { %2529 = vmatpush3.bf16.msra.mxu0 %v2689_v53 }
 0x520   :  { %2554 = vmatprep.subr.bf16.mxu0 %v2978_v21 }
 0x5d5   :  { %v845_v11 = vpop.f32.mrb[8].mxu0 }
 0x5d6   :  { %v855_v12 = vrot.slane %v845_v11, 4  ;;  %v2492_v13 = vpop.f32.mrb[9].mxu0 }
 0x5d7   :  { %v848_v14 = vpop.f32.mrb[10].mxu0 }
 0x5d8   :  { %v856_v15 = vadd.f32 %v855_v12, %v845_v11  ;;  %v2493_v16 = vpop.f32.mrb[11].mxu0  ;;  %v2202_v12 = vld [vmem:[%s3292_s5 + $0x4] sm:$0x1] }
 0x5d9   :  { %v2204_v16 = vld [vmem:[%s3293_s6 + $0x4] ss:$0 sm:$0xff] }
 0x5da   :  { %v857_v17 = vrot.slane %v856_v15, 2 }
 0x5dc   :  { %v858_v18 = vadd.f32 %v857_v17, %v856_v15 }
 0x5de   :  { %v859_v19 = vrot.slane %v858_v18, 1 }
 0x5e0   :  { %v860_v20 = vadd.f32 %v859_v19, %v858_v18 }
 0x5e2   :  { %v861_v22 = vmul.f32 0.125, %v860_v20 }
 0x5e4   :  { %v862_v23 = vsub.f32 %v845_v11, %v861_v22 }
 0x5e6   :  { %v863_v24 = vmul.f32 %v862_v23, %v862_v23 }
 0x5e8   :  { %v864_v25 = vrot.slane %v863_v24, 4 }
 0x5ea   :  { %v865_v26 = vadd.f32 %v864_v25, %v863_v24  ;;  %v2690_v25 = vld [vmem:[#allocation7 + $0x180] sm:$0xff]  }
 0x5ec   :  { %v866_v27 = vrot.slane %v865_v26, 2 }
 0x5ee   :  { %v867_v28 = vadd.f32 %v866_v27, %v865_v26  ;;  %v2691_v26 = vld [vmem:[#allocation7 + $0x188] sm:$0xff]   ;;  %v2692_v27 = vld [vmem:[#allocation7 + $0x190] sm:$0xff]  }
 0x5f0   :  { %v868_v29 = vrot.slane %v867_v28, 1 }
 0x5f2   :  { %v869_v30 = vadd.f32 %v868_v29, %v867_v28  ;;  %v2693_v28 = vld [vmem:[#allocation7 + $0x198] sm:$0xff]   ;;  %v2694_v29 = vld [vmem:[#allocation7 + $0x1a0] sm:$0xff]  }
 0x5f4   :  { %v870_v31 = vmul.f32 0.125, %v869_v30  ;;  %v2695_v30 = vld [vmem:[#allocation7 + $0x1a8] sm:$0xff]  }
 0x5f6   :  { %v871_v32 = vadd.f32 1e-05, %v870_v31  ;;  %v2696_v31 = vld [vmem:[#allocation7 + $0x1b0] sm:$0xff]  }
 0x5f8   :  { %2794 = vrsqrt.f32 %v871_v32  ;;  %v2697_v32 = vld [vmem:[#allocation7 + $0x1b8] sm:$0xff]  }
 0x602   :  { %v2795_v34 = vpop.eup %2794 }
 0x603   :  { %v873_v35 = vmul.f32 %v2795_v34, %v2190_v33 }
 0x605   :  { %v878_v36 = vrot.slane %v873_v35, %v3106_v54 }
 0x607   :  { %v880_v38 = vmul.f32 %v878_v36, %v862_v23 }
 0x609   :  { %v887_v39 = vadd.f32 %v2192_v37, %v880_v38 }
 0x60b   :  { %v2193_v40 = vmul.f32 -1.442695, %v887_v39 }
 0x60d   :  { %2796 = vpow2.f32 %v2193_v40 }
 0x617   :  { %v2797_v41 = vpop.eup %2796 }
 0x618   :  { %v891_v42 = vadd.f32 1.0, %v2797_v41 }
 0x61a   :  { %2798 = vrcp.f32 %v891_v42 }
 0x624   :  { %v2799_v43 = vpop.eup %2798 }
 0x625   :  { %v894_v44 = vpack.c.bf16 %v2799_v43, %v2799_v43 }
 0x627   :  { %2511 = vmatmul.mubr.bf16.vlgmr.msra.gmra.mrb[8].mxu1 %v894_v44 }
 0x628   :  { %2550 = vmatprep.mubr.msk.bf16.mxu1 %vm2979_vm0, %v2978_v21  ;;  %2535 = vmatpush3.bf16.msra.mxu1 %v2690_v25 }
 0x629   :  { %2536 = vmatprep.subr.bf16.mxu1 %v2978_v21 }
 0x62c   :  { %2537 = vmatpush3.bf16.msra.mxu1 %v2691_v26 }
 0x62d   :  { %2538 = vmatprep.subr.bf16.mxu1 %v2978_v21 }
 0x630   :  { %2539 = vmatpush3.bf16.msra.mxu1 %v2692_v27 }
 0x631   :  { %2540 = vmatprep.subr.bf16.mxu1 %v2978_v21 }
 0x634   :  { %2541 = vmatpush3.bf16.msra.mxu1 %v2693_v28 }
 0x635   :  { %2542 = vmatprep.subr.bf16.mxu1 %v2978_v21 }
 0x638   :  { %2543 = vmatpush3.bf16.msra.mxu1 %v2694_v29 }
 0x639   :  { %2544 = vmatprep.subr.bf16.mxu1 %v2978_v21 }
 0x63c   :  { %2545 = vmatpush3.bf16.msra.mxu1 %v2695_v30 }
 0x63d   :  { %2546 = vmatprep.subr.bf16.mxu1 %v2978_v21 }
 0x640   :  { %2547 = vmatpush3.bf16.msra.mxu1 %v2696_v31 }
 0x641   :  { %2548 = vmatprep.subr.bf16.mxu1 %v2978_v21 }
 0x644   :  { %2549 = vmatpush3.bf16.msra.mxu1 %v2697_v32 }
 0x645   :  { %2574 = vmatprep.subr.bf16.mxu1 %v2978_v21 }
 0x6fa   :  { %v994_v55 = vpop.f32.mrb[8].mxu1 }
 0x6fb   :  { %v1004_v56 = vrot.slane %v994_v55, 4  ;;  %v2512_v57 = vpop.f32.mrb[9].mxu1 }
 0x6fc   :  { %v997_v58 = vpop.f32.mrb[10].mxu1 }
 0x6fd   :  { %v1005_v59 = vadd.f32 %v1004_v56, %v994_v55  ;;  %v2513_v60 = vpop.f32.mrb[11].mxu1  ;;  %v2214_v56 = vld [vmem:[%s3292_s5 + $0x5] sm:$0x1] }
 0x6fe   :  { %v2216_v60 = vld [vmem:[%s3293_s6 + $0x5] ss:$0 sm:$0xff] }
 0x6ff   :  { %v1006_v61 = vrot.slane %v1005_v59, 2 }
 0x701   :  { %v1007_v62 = vadd.f32 %v1006_v61, %v1005_v59 }
 0x703   :  { %v1008_v63 = vrot.slane %v1007_v62, 1 }
 0x705   :  { %v1009_v0 = vadd.f32 %v1008_v63, %v1007_v62 }
 0x707   :  { %v1010_v1 = vmul.f32 0.125, %v1009_v0 }
 0x709   :  { %v1011_v2 = vsub.f32 %v994_v55, %v1010_v1 }
 0x70b   :  { %v1012_v3 = vmul.f32 %v1011_v2, %v1011_v2 }
 0x70d   :  { %v1013_v4 = vrot.slane %v1012_v3, 4 }
 0x70f   :  { %v1014_v5 = vadd.f32 %v1013_v4, %v1012_v3  ;;  %v2698_v4 = vld [vmem:[#allocation7 + $0x1c0] sm:$0xff]  }
 0x711   :  { %v1015_v6 = vrot.slane %v1014_v5, 2 }
 0x713   :  { %v1016_v7 = vadd.f32 %v1015_v6, %v1014_v5  ;;  %v2699_v5 = vld [vmem:[#allocation7 + $0x1c8] sm:$0xff]   ;;  %v2700_v6 = vld [vmem:[#allocation7 + $0x1d0] sm:$0xff]  }
 0x715   :  { %v1017_v8 = vrot.slane %v1016_v7, 1 }
 0x717   :  { %v1018_v9 = vadd.f32 %v1017_v8, %v1016_v7  ;;  %v2701_v7 = vld [vmem:[#allocation7 + $0x1d8] sm:$0xff]   ;;  %v2702_v8 = vld [vmem:[#allocation7 + $0x1e0] sm:$0xff]  }
 0x719   :  { %v1019_v10 = vmul.f32 0.125, %v1018_v9  ;;  %v2703_v9 = vld [vmem:[#allocation7 + $0x1e8] sm:$0xff]  }
 0x71b   :  { %v1020_v11 = vadd.f32 1e-05, %v1019_v10  ;;  %v2704_v10 = vld [vmem:[#allocation7 + $0x1f0] sm:$0xff]  }
 0x71d   :  { %2800 = vrsqrt.f32 %v1020_v11  ;;  %v2705_v11 = vld [vmem:[#allocation7 + $0x1f8] sm:$0xff]  }
 0x727   :  { %v2801_v13 = vpop.eup %2800 }
 0x728   :  { %v1022_v14 = vmul.f32 %v2801_v13, %v2202_v12 }
 0x72a   :  { %v1027_v15 = vrot.slane %v1022_v14, %v3106_v54 }
 0x72c   :  { %v1029_v17 = vmul.f32 %v1027_v15, %v1011_v2 }
 0x72e   :  { %v1036_v18 = vadd.f32 %v2204_v16, %v1029_v17 }
 0x730   :  { %v2205_v19 = vmul.f32 -1.442695, %v1036_v18 }
 0x732   :  { %2802 = vpow2.f32 %v2205_v19 }
 0x73c   :  { %v2803_v20 = vpop.eup %2802 }
 0x73d   :  { %v1040_v22 = vadd.f32 1.0, %v2803_v20 }
 0x73f   :  { %2804 = vrcp.f32 %v1040_v22 }
 0x749   :  { %v2805_v23 = vpop.eup %2804 }
 0x74a   :  { %v1043_v24 = vpack.c.bf16 %v2805_v23, %v2805_v23 }
 0x74c   :  { %2531 = vmatmul.mubr.bf16.vlgmr.msra.gmra.mrb[12].mxu0 %v1043_v24 }
 0x74d   :  { %2570 = vmatprep.mubr.msk.bf16.mxu0 %vm2979_vm0, %v2978_v21  ;;  %2555 = vmatpush3.bf16.msra.mxu0 %v2698_v4 }
 0x74e   :  { %2556 = vmatprep.subr.bf16.mxu0 %v2978_v21 }
 0x751   :  { %2557 = vmatpush3.bf16.msra.mxu0 %v2699_v5 }
 0x752   :  { %2558 = vmatprep.subr.bf16.mxu0 %v2978_v21 }
 0x755   :  { %2559 = vmatpush3.bf16.msra.mxu0 %v2700_v6 }
 0x756   :  { %2560 = vmatprep.subr.bf16.mxu0 %v2978_v21 }
 0x759   :  { %2561 = vmatpush3.bf16.msra.mxu0 %v2701_v7 }
 0x75a   :  { %2562 = vmatprep.subr.bf16.mxu0 %v2978_v21 }
 0x75d   :  { %2563 = vmatpush3.bf16.msra.mxu0 %v2702_v8 }
 0x75e   :  { %2564 = vmatprep.subr.bf16.mxu0 %v2978_v21 }
 0x761   :  { %2565 = vmatpush3.bf16.msra.mxu0 %v2703_v9 }
 0x762   :  { %2566 = vmatprep.subr.bf16.mxu0 %v2978_v21 }
 0x765   :  { %2567 = vmatpush3.bf16.msra.mxu0 %v2704_v10 }
 0x766   :  { %2568 = vmatprep.subr.bf16.mxu0 %v2978_v21 }
 0x769   :  { %2569 = vmatpush3.bf16.msra.mxu0 %v2705_v11 }
 0x76a   :  { %2594 = vmatprep.subr.bf16.mxu0 %v2978_v21 }
 0x81f   :  { %v1143_v33 = vpop.f32.mrb[12].mxu0 }
 0x820   :  { %v1153_v34 = vrot.slane %v1143_v33, 4  ;;  %v2532_v35 = vpop.f32.mrb[13].mxu0 }
 0x821   :  { %v1146_v36 = vpop.f32.mrb[14].mxu0 }
 0x822   :  { %v1154_v37 = vadd.f32 %v1153_v34, %v1143_v33  ;;  %v2533_v38 = vpop.f32.mrb[15].mxu0  ;;  %v2226_v34 = vld [vmem:[%s3292_s5 + $0x6] sm:$0x1] }
 0x823   :  { %v2228_v38 = vld [vmem:[%s3293_s6 + $0x6] ss:$0 sm:$0xff] }
 0x824   :  { %v1155_v39 = vrot.slane %v1154_v37, 2 }
 0x826   :  { %v1156_v40 = vadd.f32 %v1155_v39, %v1154_v37 }
 0x828   :  { %v1157_v41 = vrot.slane %v1156_v40, 1 }
 0x82a   :  { %v1158_v42 = vadd.f32 %v1157_v41, %v1156_v40 }
 0x82c   :  { %v1159_v43 = vmul.f32 0.125, %v1158_v42 }
 0x82e   :  { %v1160_v44 = vsub.f32 %v1143_v33, %v1159_v43 }
 0x830   :  { %v1161_v45 = vmul.f32 %v1160_v44, %v1160_v44 }
 0x832   :  { %v1162_v46 = vrot.slane %v1161_v45, 4 }
 0x834   :  { %v1163_v47 = vadd.f32 %v1162_v46, %v1161_v45  ;;  %v2706_v46 = vld [vmem:[#allocation7 + $0x200] sm:$0xff]  }
 0x836   :  { %v1164_v48 = vrot.slane %v1163_v47, 2 }
 0x838   :  { %v1165_v49 = vadd.f32 %v1164_v48, %v1163_v47  ;;  %v2707_v47 = vld [vmem:[#allocation7 + $0x208] sm:$0xff]   ;;  %v2708_v48 = vld [vmem:[#allocation7 + $0x210] sm:$0xff]  }
 0x83a   :  { %v1166_v50 = vrot.slane %v1165_v49, 1 }
 0x83c   :  { %v1167_v51 = vadd.f32 %v1166_v50, %v1165_v49  ;;  %v2709_v49 = vld [vmem:[#allocation7 + $0x218] sm:$0xff]   ;;  %v2710_v50 = vld [vmem:[#allocation7 + $0x220] sm:$0xff]  }
 0x83e   :  { %v1168_v53 = vmul.f32 0.125, %v1167_v51  ;;  %v2711_v51 = vld [vmem:[#allocation7 + $0x228] sm:$0xff]  }
 0x840   :  { %v1169_v55 = vadd.f32 1e-05, %v1168_v53  ;;  %v2712_v53 = vld [vmem:[#allocation7 + $0x230] sm:$0xff]  }
 0x842   :  { %2806 = vrsqrt.f32 %v1169_v55  ;;  %v2713_v55 = vld [vmem:[#allocation7 + $0x238] sm:$0xff]  }
 0x84c   :  { %v2807_v57 = vpop.eup %2806 }
 0x84d   :  { %v1171_v58 = vmul.f32 %v2807_v57, %v2214_v56 }
 0x84f   :  { %v1176_v59 = vrot.slane %v1171_v58, %v3106_v54 }
 0x851   :  { %v1178_v61 = vmul.f32 %v1176_v59, %v1160_v44 }
 0x853   :  { %v1185_v62 = vadd.f32 %v2216_v60, %v1178_v61 }
 0x855   :  { %v2217_v63 = vmul.f32 -1.442695, %v1185_v62 }
 0x857   :  { %2808 = vpow2.f32 %v2217_v63 }
 0x861   :  { %v2809_v0 = vpop.eup %2808 }
 0x862   :  { %v1189_v1 = vadd.f32 1.0, %v2809_v0 }
 0x864   :  { %2810 = vrcp.f32 %v1189_v1 }
 0x86e   :  { %v2811_v2 = vpop.eup %2810 }
 0x86f   :  { %v1192_v3 = vpack.c.bf16 %v2811_v2, %v2811_v2 }
 0x871   :  { %2551 = vmatmul.mubr.bf16.vlgmr.msra.gmra.mrb[12].mxu1 %v1192_v3 }
 0x872   :  { %2590 = vmatprep.mubr.msk.bf16.mxu1 %vm2979_vm0, %v2978_v21  ;;  %2575 = vmatpush3.bf16.msra.mxu1 %v2706_v46 }
 0x873   :  { %2576 = vmatprep.subr.bf16.mxu1 %v2978_v21 }
 0x876   :  { %2577 = vmatpush3.bf16.msra.mxu1 %v2707_v47 }
 0x877   :  { %2578 = vmatprep.subr.bf16.mxu1 %v2978_v21 }
 0x87a   :  { %2579 = vmatpush3.bf16.msra.mxu1 %v2708_v48 }
 0x87b   :  { %2580 = vmatprep.subr.bf16.mxu1 %v2978_v21 }
 0x87e   :  { %2581 = vmatpush3.bf16.msra.mxu1 %v2709_v49 }
 0x87f   :  { %2582 = vmatprep.subr.bf16.mxu1 %v2978_v21 }
 0x882   :  { %2583 = vmatpush3.bf16.msra.mxu1 %v2710_v50 }
 0x883   :  { %2584 = vmatprep.subr.bf16.mxu1 %v2978_v21 }
 0x886   :  { %2585 = vmatpush3.bf16.msra.mxu1 %v2711_v51 }
 0x887   :  { %2586 = vmatprep.subr.bf16.mxu1 %v2978_v21 }
 0x88a   :  { %2587 = vmatpush3.bf16.msra.mxu1 %v2712_v53 }
 0x88b   :  { %2588 = vmatprep.subr.bf16.mxu1 %v2978_v21 }
 0x88e   :  { %2589 = vmatpush3.bf16.msra.mxu1 %v2713_v55 }
 0x944   :  { %v1292_v12 = vpop.f32.mrb[12].mxu1 }
 0x945   :  { %v1302_v13 = vrot.slane %v1292_v12, 4  ;;  %v2552_v14 = vpop.f32.mrb[13].mxu1 }
 0x946   :  { %v1295_v15 = vpop.f32.mrb[14].mxu1 }
 0x947   :  { %v1303_v16 = vadd.f32 %v1302_v13, %v1292_v12  ;;  %v2553_v17 = vpop.f32.mrb[15].mxu1  ;;  %v2238_v13 = vld [vmem:[%s3292_s5 + $0x7] sm:$0x1] }
 0x948   :  { %v2240_v17 = vld [vmem:[%s3293_s6 + $0x7] ss:$0 sm:$0xff] }
 0x949   :  { %v1304_v18 = vrot.slane %v1303_v16, 2 }
 0x94b   :  { %v1305_v19 = vadd.f32 %v1304_v18, %v1303_v16 }
 0x94d   :  { %v1306_v20 = vrot.slane %v1305_v19, 1 }
 0x94f   :  { %v1307_v22 = vadd.f32 %v1306_v20, %v1305_v19 }
 0x951   :  { %v1308_v23 = vmul.f32 0.125, %v1307_v22 }
 0x953   :  { %v1309_v24 = vsub.f32 %v1292_v12, %v1308_v23 }
 0x955   :  { %v1310_v25 = vmul.f32 %v1309_v24, %v1309_v24 }
 0x957   :  { %v1311_v26 = vrot.slane %v1310_v25, 4 }
 0x959   :  { %v1312_v27 = vadd.f32 %v1311_v26, %v1310_v25  ;;  %v2714_v26 = vld [vmem:[#allocation7 + $0x240] sm:$0xff]  }
 0x95b   :  { %v1313_v28 = vrot.slane %v1312_v27, 2 }
 0x95d   :  { %v1314_v29 = vadd.f32 %v1313_v28, %v1312_v27  ;;  %v2715_v27 = vld [vmem:[#allocation7 + $0x248] sm:$0xff]   ;;  %v2716_v28 = vld [vmem:[#allocation7 + $0x250] sm:$0xff]  }
 0x95f   :  { %v1315_v30 = vrot.slane %v1314_v29, 1 }
 0x961   :  { %v1316_v31 = vadd.f32 %v1315_v30, %v1314_v29  ;;  %v2717_v29 = vld [vmem:[#allocation7 + $0x258] sm:$0xff]   ;;  %v2718_v30 = vld [vmem:[#allocation7 + $0x260] sm:$0xff]  }
 0x963   :  { %v1317_v32 = vmul.f32 0.125, %v1316_v31  ;;  %v2719_v31 = vld [vmem:[#allocation7 + $0x268] sm:$0xff]  }
 0x965   :  { %v1318_v33 = vadd.f32 1e-05, %v1317_v32  ;;  %v2720_v32 = vld [vmem:[#allocation7 + $0x270] sm:$0xff]  }
 0x967   :  { %2812 = vrsqrt.f32 %v1318_v33  ;;  %v2721_v33 = vld [vmem:[#allocation7 + $0x278] sm:$0xff]  }
 0x971   :  { %v2813_v35 = vpop.eup %2812 }
 0x972   :  { %v1320_v36 = vmul.f32 %v2813_v35, %v2226_v34 }
 0x974   :  { %v1325_v37 = vrot.slane %v1320_v36, %v3106_v54 }
 0x976   :  { %v1327_v39 = vmul.f32 %v1325_v37, %v1309_v24 }
 0x978   :  { %v1334_v40 = vadd.f32 %v2228_v38, %v1327_v39 }
 0x97a   :  { %v2229_v41 = vmul.f32 -1.442695, %v1334_v40 }
 0x97c   :  { %2814 = vpow2.f32 %v2229_v41 }
 0x986   :  { %v2815_v42 = vpop.eup %2814 }
 0x987   :  { %v1338_v43 = vadd.f32 1.0, %v2815_v42 }
 0x989   :  { %2816 = vrcp.f32 %v1338_v43 }
 0x993   :  { %v2817_v44 = vpop.eup %2816 }
 0x994   :  { %v1341_v45 = vpack.c.bf16 %v2817_v44, %v2817_v44 }
 0x996   :  { %2571 = vmatmul.mubr.bf16.vlgmr.msra.gmra.mrb[16].mxu0 %v1341_v45 }
 0x997   :  { %2610 = vmatprep.mubr.msk.bf16.mxu0 %vm2979_vm0, %v2978_v21  ;;  %2595 = vmatpush3.bf16.msra.mxu0 %v2714_v26  ;;  %v2757_v26 = vld [vmem:[#allocation8 + $0xac] ss:$16 sps:$4 sm:$0xff]  }
 0x998   :  { %2596 = vmatprep.subr.bf16.mxu0 %v2978_v21 }
 0x99b   :  { %2597 = vmatpush3.bf16.msra.mxu0 %v2715_v27  ;;  %v2980_v27 = vmov 0  }
 0x99c   :  { %2598 = vmatprep.subr.bf16.mxu0 %v2978_v21 }
 0x99f   :  { %2599 = vmatpush3.bf16.msra.mxu0 %v2716_v28  ;;  %v2752_v28 = vld [vmem:[#allocation8 + $0xa0] ss:$16 sps:$4 sm:$0xff]  }
 0x9a0   :  { %2600 = vmatprep.subr.bf16.mxu0 %v2978_v21 }
 0x9a3   :  { %2601 = vmatpush3.bf16.msra.mxu0 %v2717_v29  ;;  %v2755_v29 = vld [vmem:[#allocation8 + $0xa8] ss:$16 sps:$4 sm:$0xff]  }
 0x9a4   :  { %2602 = vmatprep.subr.bf16.mxu0 %v2978_v21 }
 0x9a7   :  { %2603 = vmatpush3.bf16.msra.mxu0 %v2718_v30  ;;  %v2760_v30 = vld [vmem:[#allocation8 + $0xc4] ss:$16 sps:$4 sm:$0xff]  }
 0x9a8   :  { %2604 = vmatprep.subr.bf16.mxu0 %v2978_v21 }
 0x9ab   :  { %2605 = vmatpush3.bf16.msra.mxu0 %v2719_v31  ;;  %v2763_v31 = vld [vmem:[#allocation8 + $0xcc] ss:$16 sps:$4 sm:$0xff]  }
 0x9ac   :  { %2606 = vmatprep.subr.bf16.mxu0 %v2978_v21 }
 0x9af   :  { %2607 = vmatpush3.bf16.msra.mxu0 %v2720_v32  ;;  %v2758_v32 = vld [vmem:[#allocation8 + $0xc0] ss:$16 sps:$4 sm:$0xff]  }
 0x9b0   :  { %2608 = vmatprep.subr.bf16.mxu0 %v2978_v21 }
 0x9b3   :  { %2609 = vmatpush3.bf16.msra.mxu0 %v2721_v33  ;;  %v2761_v33 = vld [vmem:[#allocation8 + $0xc8] ss:$16 sps:$4 sm:$0xff]  }
 0xa69   :  { %v1441_v56 = vpop.f32.mrb[16].mxu0 }
 0xa6a   :  { %v1451_v57 = vrot.slane %v1441_v56, 4  ;;  %v2572_v58 = vpop.f32.mrb[17].mxu0 }
 0xa6b   :  { %v1444_v59 = vpop.f32.mrb[18].mxu0 }
 0xa6c   :  { %v1452_v60 = vadd.f32 %v1451_v57, %v1441_v56  ;;  %v2573_v61 = vpop.f32.mrb[19].mxu0 }
 0xa6e   :  { %v1453_v62 = vrot.slane %v1452_v60, 2 }
 0xa70   :  { %v1454_v63 = vadd.f32 %v1453_v62, %v1452_v60  ;;  %v2252_v60 = vld [vmem:[%s3293_s6 + $0x8] ss:$0 sm:$0xff] }
 0xa72   :  { %v1455_v0 = vrot.slane %v1454_v63, 1 }
 0xa74   :  { %v1456_v1 = vadd.f32 %v1455_v0, %v1454_v63 }
 0xa76   :  { %v1457_v2 = vmul.f32 0.125, %v1456_v1 }
 0xa78   :  { %v1458_v3 = vsub.f32 %v1441_v56, %v1457_v2  ;;  %v2250_v56 = vld [vmem:[%s3292_s5 + $0x8] sm:$0x1] }
 0xa7a   :  { %v1459_v4 = vmul.f32 %v1458_v3, %v1458_v3 }
 0xa7c   :  { %v1460_v5 = vrot.slane %v1459_v4, 4 }
 0xa7e   :  { %v1461_v6 = vadd.f32 %v1460_v5, %v1459_v4  ;;  %v2724_v4 = vld [vmem:[#allocation8 + $0x4] ss:$16 sps:$4 sm:$0xff]   ;;  %v2727_v5 = vld [vmem:[#allocation8 + $0xc] ss:$16 sps:$4 sm:$0xff]  }
 0xa7f   :  { %2003 = vmatprep.subr.bf16.mxu1 %v2724_v4  ;;  %2044 = vmatprep.subr.bf16.mxu0 %v2727_v5 }
 0xa80   :  { %v1462_v7 = vrot.slane %v1461_v6, 2 }
 0xa82   :  { %v1463_v8 = vadd.f32 %v1462_v7, %v1461_v6  ;;  %v2722_v6 = vld [vmem:[#allocation8] ss:$16 sps:$4 sm:$0xff]   ;;  %v2725_v7 = vld [vmem:[#allocation8 + $0x8] ss:$16 sps:$4 sm:$0xff]  }
 0xa84   :  { %v1464_v9 = vrot.slane %v1463_v8, 1 }
 0xa86   :  { %v1465_v10 = vadd.f32 %v1464_v9, %v1463_v8  ;;  %v2730_v8 = vld [vmem:[#allocation8 + $0x24] ss:$16 sps:$4 sm:$0xff]   ;;  %v2733_v9 = vld [vmem:[#allocation8 + $0x2c] ss:$16 sps:$4 sm:$0xff]  }
 0xa88   :  { %v1466_v11 = vmul.f32 0.125, %v1465_v10  ;;  %v2728_v10 = vld [vmem:[#allocation8 + $0x20] ss:$16 sps:$4 sm:$0xff]  }
 0xa8a   :  { %v1467_v12 = vadd.f32 1e-05, %v1466_v11  ;;  %v2731_v11 = vld [vmem:[#allocation8 + $0x28] ss:$16 sps:$4 sm:$0xff]  }
 0xa8c   :  { %2818 = vrsqrt.f32 %v1467_v12  ;;  %v2734_v12 = vld [vmem:[#allocation8 + $0x40] ss:$16 sps:$4 sm:$0xff]  }
 0xa96   :  { %v2819_v14 = vpop.eup %2818 }
 0xa97   :  { %v1469_v15 = vmul.f32 %v2819_v14, %v2238_v13  ;;  %v2736_v13 = vld [vmem:[#allocation8 + $0x44] ss:$16 sps:$4 sm:$0xff]   ;;  %v2737_v14 = vld [vmem:[#allocation8 + $0x48] ss:$16 sps:$4 sm:$0xff]  }
 0xa99   :  { %v1474_v16 = vrot.slane %v1469_v15, %v3106_v54  ;;  %v2739_v15 = vld [vmem:[#allocation8 + $0x4c] ss:$16 sps:$4 sm:$0xff]  }
 0xa9b   :  { %v1476_v18 = vmul.f32 %v1474_v16, %v1458_v3  ;;  %v2742_v16 = vld [vmem:[#allocation8 + $0x64] ss:$16 sps:$4 sm:$0xff]  }
 0xa9d   :  { %v1483_v19 = vadd.f32 %v2240_v17, %v1476_v18  ;;  %v2745_v17 = vld [vmem:[#allocation8 + $0x6c] ss:$16 sps:$4 sm:$0xff]   ;;  %v2740_v18 = vld [vmem:[#allocation8 + $0x60] ss:$16 sps:$4 sm:$0xff]  }
 0xa9f   :  { %v2241_v20 = vmul.f32 -1.442695, %v1483_v19  ;;  %v2743_v19 = vld [vmem:[#allocation8 + $0x68] ss:$16 sps:$4 sm:$0xff]  }
 0xaa1   :  { %2820 = vpow2.f32 %v2241_v20  ;;  %v2748_v20 = vld [vmem:[#allocation8 + $0x84] ss:$16 sps:$4 sm:$0xff]  }
 0xaab   :  { %v2821_v22 = vpop.eup %2820 }
 0xaac   :  { %v1487_v23 = vadd.f32 1.0, %v2821_v22  ;;  %v2751_v22 = vld [vmem:[#allocation8 + $0x8c] ss:$16 sps:$4 sm:$0xff]  }
 0xaae   :  { %2822 = vrcp.f32 %v1487_v23  ;;  %v2746_v23 = vld [vmem:[#allocation8 + $0x80] ss:$16 sps:$4 sm:$0xff]  }
 0xab8   :  { %v2823_v24 = vpop.eup %2822 }
 0xab9   :  { %v1490_v25 = vpack.c.bf16 %v2823_v24, %v2823_v24  ;;  %v2749_v24 = vld [vmem:[#allocation8 + $0x88] ss:$16 sps:$4 sm:$0xff]  }
 0xabb   :  { %2591 = vmatmul.mubr.bf16.vlgmr.msra.gmra.mrb[16].mxu1 %v1490_v25  ;;  %v2754_v25 = vld [vmem:[#allocation8 + $0xa4] ss:$16 sps:$4 sm:$0xff]  }
 0xabc   :  { %2004 = vmatpush1.bf16.msra.mxu1 %v2722_v6  ;;  %2035 = vmatprep.mubr.bf16.mxu1 %v2980_v27 }
 0xabd   :  { %2005 = vmatprep.subr.bf16.mxu1 %v2730_v8  ;;  %v1833_v8 = vsub.s32 2, %v3100_v52 }
 0xac0   :  { %2006 = vmatpush1.bf16.msra.mxu1 %v2728_v10  ;;  %v1829_v10 = vsub.s32 1, %v3100_v52 }
 0xac1   :  { %2007 = vmatprep.subr.bf16.mxu1 %v2736_v13 }
 0xac4   :  { %2008 = vmatpush1.bf16.msra.mxu1 %v2734_v12 }
 0xac5   :  { %2009 = vmatprep.subr.bf16.mxu1 %v2742_v16 }
 0xac8   :  { %2010 = vmatpush1.bf16.msra.mxu1 %v2740_v18 }
 0xac9   :  { %2011 = vmatprep.subr.bf16.mxu1 %v2748_v20 }
 0xacc   :  { %2012 = vmatpush1.bf16.msra.mxu1 %v2746_v23 }
 0xacd   :  { %2013 = vmatprep.subr.bf16.mxu1 %v2754_v25 }
 0xad0   :  { %2014 = vmatpush1.bf16.msra.mxu1 %v2752_v28 }
 0xad1   :  { %2015 = vmatprep.subr.bf16.mxu1 %v2760_v30 }
 0xad4   :  { %2016 = vmatpush1.bf16.msra.mxu1 %v2758_v32 }
 0xb8e   :  { %v1590_v34 = vpop.f32.mrb[16].mxu1 }
 0xb8f   :  { %v1600_v35 = vrot.slane %v1590_v34, 4  ;;  %v2592_v36 = vpop.f32.mrb[17].mxu1 }
 0xb90   :  { %v1593_v37 = vpop.f32.mrb[18].mxu1  ;;  %v2764_v36 = vld [vmem:[#allocation8 + $0xe0] ss:$16 sps:$4 sm:$0xff]  }
 0xb91   :  { %v1601_v38 = vadd.f32 %v1600_v35, %v1590_v34  ;;  %v2593_v39 = vpop.f32.mrb[19].mxu1  ;;  %v2769_v35 = vld [vmem:[#allocation8 + $0xec] ss:$16 sps:$4 sm:$0xff]   ;;  %v2767_v37 = vld [vmem:[#allocation8 + $0xe8] ss:$16 sps:$4 sm:$0xff]  }
 0xb93   :  { %v1602_v40 = vrot.slane %v1601_v38, 2 }
 0xb95   :  { %v1603_v41 = vadd.f32 %v1602_v40, %v1601_v38 }
 0xb97   :  { %v1604_v42 = vrot.slane %v1603_v41, 1 }
 0xb99   :  { %v1605_v43 = vadd.f32 %v1604_v42, %v1603_v41 }
 0xb9b   :  { %v1606_v44 = vmul.f32 0.125, %v1605_v43 }
 0xb9d   :  { %v1607_v45 = vsub.f32 %v1590_v34, %v1606_v44  ;;  %v2766_v34 = vld [vmem:[#allocation8 + $0xe4] ss:$16 sps:$4 sm:$0xff]  }
 0xb9e   :  { %2017 = vmatprep.subr.bf16.mxu1 %v2766_v34 }
 0xb9f   :  { %v1608_v46 = vmul.f32 %v1607_v45, %v1607_v45  ;;  %2018 = vmatpush1.bf16.msra.mxu1 %v2764_v36 }
 0xba1   :  { %v1609_v47 = vrot.slane %v1608_v46, 4 }
 0xba3   :  { %v1610_v48 = vadd.f32 %v1609_v47, %v1608_v46 }
 0xba5   :  { %v1611_v49 = vrot.slane %v1610_v48, 2 }
 0xba7   :  { %v1612_v50 = vadd.f32 %v1611_v49, %v1610_v48 }
 0xba9   :  { %v1613_v51 = vrot.slane %v1612_v50, 1 }
 0xbab   :  { %v1614_v21 = vadd.f32 %v1613_v51, %v1612_v50 }
 0xbad   :  { %v1615_v53 = vmul.f32 0.125, %v1614_v21 }
 0xbaf   :  { %v1616_v55 = vadd.f32 1e-05, %v1615_v53 }
 0xbb1   :  { %2824 = vrsqrt.f32 %v1616_v55 }
 0xbbb   :  { %v2825_v57 = vpop.eup %2824 }
 0xbbc   :  { %v1618_v58 = vmul.f32 %v2825_v57, %v2250_v56 }
 0xbbe   :  { %v1623_v59 = vrot.slane %v1618_v58, %v3106_v54 }
 0xbc0   :  { %v1625_v61 = vmul.f32 %v1623_v59, %v1607_v45 }
 0xbc2   :  { %v1632_v62 = vadd.f32 %v2252_v60, %v1625_v61  ;;  %v2262_v60 = vld [vmem:[%s3292_s5 + $0x9] sm:$0x1] }
 0xbc4   :  { %v2253_v63 = vmul.f32 -1.442695, %v1632_v62 }
 0xbc6   :  { %2826 = vpow2.f32 %v2253_v63 }
 0xbd0   :  { %v2827_v0 = vpop.eup %2826 }
 0xbd1   :  { %v1636_v1 = vadd.f32 1.0, %v2827_v0  ;;  %v2264_v0 = vld [vmem:[%s3293_s6 + $0x9] ss:$0 sm:$0xff]  ;;  %s2981_s6 = smov [#allocation10]  }
 0xbd3   :  { %2828 = vrcp.f32 %v1636_v1 }
 0xbdd   :  { %v2829_v2 = vpop.eup %2828 }
 0xbde   :  { %v1639_v3 = vpack.c.bf16 %v2829_v2, %v2829_v2 }
 0xbe0   :  { %2611 = vmatmul.mubr.bf16.vlgmr.msra.gmra.mrb[20].mxu0 %v1639_v3 }
 0xbe1   :  { %2045 = vmatpush1.bf16.msra.mxu0 %v2725_v7  ;;  %2076 = vmatprep.mubr.bf16.mxu0 %v2980_v27 }
 0xbe2   :  { %2046 = vmatprep.subr.bf16.mxu0 %v2733_v9  ;;  %v1821_v9 = vld [vmem:[%s3295_s8] sm:$0xf]  ;;  %s2119_s8 = sshll.u32 %s2981_s6, 4  ;;  %s2120_s8 = int_to_ptr.vmem [resolvable:$true] %s2119_s8 }
 0xbe3   :  { %v1826_v12 = vrot.slane %v1821_v9, %v3106_v54  ;;  %v1834_v13 = vrot.slane %v1821_v9, %v1833_v8  ;;  %s2940_s12 = scalar_lea.vmem %s2120_s8, 512  ;;  %p2945_p5 = scmp.lt.s32.totalorder %s2120_s8, %s2120_s8 }
 0xbe4   :  { %p2941_p4 = scmp.ne.s32.totalorder %s2120_s8, %s2940_s12  ;;  %p2946_p6 = scmp.lt.s32.totalorder %s2940_s12, %s2940_s12 }
 0xbe5   :  { %2047 = vmatpush1.bf16.msra.mxu0 %v2731_v11  ;;  %v1837_v11 = vsub.s32 3, %v3100_v52 }
 0xbe6   :  { %2048 = vmatprep.subr.bf16.mxu0 %v2739_v15  ;;  %p2947_p7 = por %p2946_p6, %p2945_p5 }
 0xbe7   :  { %v1838_v15 = vrot.slane %v1821_v9, %v1837_v11 }
 0xbe8   :  { %p2948_p8 = pnand %p2947_p7, %p2941_p4 }
 0xbe9   :  { %2049 = vmatpush1.bf16.msra.mxu0 %v2737_v14  ;;  %v1830_v14 = vrot.slane %v1821_v9, %v1829_v10 }
 0xbea   :  { %2050 = vmatprep.subr.bf16.mxu0 %v2745_v17 }
 0xbed   :  { %2051 = vmatpush1.bf16.msra.mxu0 %v2743_v19 }
 0xbee   :  { %2052 = vmatprep.subr.bf16.mxu0 %v2751_v22 }
 0xbf1   :  { %2053 = vmatpush1.bf16.msra.mxu0 %v2749_v24 }
 0xbf2   :  { %2054 = vmatprep.subr.bf16.mxu0 %v2757_v26 }
 0xbf5   :  { %2055 = vmatpush1.bf16.msra.mxu0 %v2755_v29 }
 0xbf6   :  { %2056 = vmatprep.subr.bf16.mxu0 %v2763_v31 }
 0xbf9   :  { %2057 = vmatpush1.bf16.msra.mxu0 %v2761_v33 }
 0xbfa   :  { %2058 = vmatprep.subr.bf16.mxu0 %v2769_v35 }
 0xbfd   :  { %2059 = vmatpush1.bf16.msra.mxu0 %v2767_v37 }
 0xcb3   :  { %v1739_v38 = vpop.f32.mrb[20].mxu0 }
 0xcb4   :  { %v1749_v39 = vrot.slane %v1739_v38, 4  ;;  %v2612_v40 = vpop.f32.mrb[21].mxu0 }
 0xcb5   :  { %v1742_v41 = vpop.f32.mrb[22].mxu0 }
 0xcb6   :  { %v1750_v42 = vadd.f32 %v1749_v39, %v1739_v38  ;;  %v2613_v43 = vpop.f32.mrb[23].mxu0 }
 0xcb8   :  { %v1751_v44 = vrot.slane %v1750_v42, 2 }
 0xcba   :  { %v1752_v45 = vadd.f32 %v1751_v44, %v1750_v42 }
 0xcbc   :  { %v1753_v46 = vrot.slane %v1752_v45, 1 }
 0xcbe   :  { %v1754_v47 = vadd.f32 %v1753_v46, %v1752_v45 }
 0xcc0   :  { %v1755_v48 = vmul.f32 0.125, %v1754_v47 }
 0xcc2   :  { %v1756_v49 = vsub.f32 %v1739_v38, %v1755_v48 }
 0xcc4   :  { %v1757_v50 = vmul.f32 %v1756_v49, %v1756_v49 }
 0xcc6   :  { %v1758_v51 = vrot.slane %v1757_v50, 4 }
 0xcc8   :  { %v1759_v21 = vadd.f32 %v1758_v51, %v1757_v50 }
 0xcca   :  { %v1760_v53 = vrot.slane %v1759_v21, 2 }
 0xccc   :  { %v1761_v55 = vadd.f32 %v1760_v53, %v1759_v21 }
 0xcce   :  { %v1762_v56 = vrot.slane %v1761_v55, 1 }
 0xcd0   :  { %v1763_v57 = vadd.f32 %v1762_v56, %v1761_v55 }
 0xcd2   :  { %v1764_v58 = vmul.f32 0.125, %v1763_v57 }
 0xcd4   :  { %v1765_v59 = vadd.f32 1e-05, %v1764_v58 }
 0xcd6   :  { %2830 = vrsqrt.f32 %v1765_v59 }
 0xce0   :  { %v2831_v61 = vpop.eup %2830 }
 0xce1   :  { %v1767_v62 = vmul.f32 %v2831_v61, %v2262_v60 }
 0xce3   :  { %v1772_v63 = vrot.slane %v1767_v62, %v3106_v54 }
 0xce5   :  { %v1774_v1 = vmul.f32 %v1772_v63, %v1756_v49 }
 0xce7   :  { %v1781_v2 = vadd.f32 %v2264_v0, %v1774_v1 }
 0xce9   :  { %v2265_v3 = vmul.f32 -1.442695, %v1781_v2 }
 0xceb   :  { %2832 = vpow2.f32 %v2265_v3 }
 0xcf5   :  { %v2833_v4 = vpop.eup %2832 }
 0xcf6   :  { %v1785_v5 = vadd.f32 1.0, %v2833_v4 }
 0xcf8   :  { %2834 = vrcp.f32 %v1785_v5 }
 0xd02   :  { %v2835_v6 = vpop.eup %2834 }
 0xd03   :  { %v1788_v7 = vpack.c.bf16 %v2835_v6, %v2835_v6 }
 0xd05   :  { %2036 = vmatmul.mubr.bf16.vlgmr.msra.gmra.mrb[20].mxu1 %v1788_v7  ;;  %2077 = vmatmul.mubr.bf16.vlgmr.msra.gmra.mrb[24].mxu0 %v1788_v7 }
 0xdd8   :  { %v2037_v16 = vpop.f32.mrb[20].mxu1  ;;  %v2078_v17 = vpop.f32.mrb[24].mxu0 }
 0xdd9   :  { %v2038_v18 = vadd.f32 %v2037_v16, %v1826_v12  ;;  %v2079_v19 = vadd.f32 %v2078_v17, %v1834_v13  ;;  %v2039_v20 = vpop.f32.mrb[21].mxu1  ;;  %v2080_v22 = vpop.f32.mrb[25].mxu0 }
 0xdda   :  { %v2040_v23 = vadd.f32 %v2039_v20, %v1830_v14  ;;  %v2081_v24 = vadd.f32 %v2080_v22, %v1838_v15  ;;  %v2041_v25 = vpop.f32.mrb[22].mxu1  ;;  %v2082_v26 = vpop.f32.mrb[26].mxu0 }
 0xddb   :  { %v2298_v27 = vmul.f32 -1.442695, %v2038_v18  ;;  %v2300_v28 = vmul.f32 -1.442695, %v2079_v19  ;;  %v2042_v29 = vpop.f32.mrb[23].mxu1  ;;  %v2083_v30 = vpop.f32.mrb[27].mxu0 }
 0xddc   :  { %v2299_v52 = vmul.f32 -1.442695, %v2040_v23  ;;  %v2301_v31 = vmul.f32 -1.442695, %v2081_v24 }
 0xddd   :  { %2836 = vpow2.f32 %v2298_v27 }
 0xdde   :  { %2838 = vpow2.f32 %v2300_v28 }
 0xddf   :  { %2840 = vpow2.f32 %v2299_v52 }
 0xde0   :  { %2842 = vpow2.f32 %v2301_v31 }
 0xde7   :  { %v2837_v54 = vpop.eup %2836 }
 0xde8   :  { %v2839_v32 = vpop.eup %2838  ;;  %v2097_v33 = vadd.f32 1.0, %v2837_v54 }
 0xde9   :  { %v2841_v34 = vpop.eup %2840  ;;  %v2099_v35 = vadd.f32 1.0, %v2839_v32 }
 0xdea   :  { %v2843_v36 = vpop.eup %2842  ;;  %2844 = vrcp.f32 %v2097_v33  ;;  %v2098_v37 = vadd.f32 1.0, %v2841_v34 }
 0xdeb   :  { %2846 = vrcp.f32 %v2099_v35  ;;  %v2100_v38 = vadd.f32 1.0, %v2843_v36 }
 0xdec   :  { %2848 = vrcp.f32 %v2098_v37 }
 0xded   :  { %2850 = vrcp.f32 %v2100_v38 }
 0xdf4   :  { %v2845_v39 = vpop.eup %2844 }
 0xdf5   :  { %v2847_v40 = vpop.eup %2846  ;;  %2109 = vst [vmem:[#allocation10] sm:$0xff] %v2845_v39 }
 0xdf6   :  { %v2849_v41 = vpop.eup %2848  ;;  %2111 = vst [vmem:[#allocation10 + $0x10] sm:$0xff] %v2847_v40 }
 0xdf7   :  { %v2851_v42 = vpop.eup %2850  ;;  %2110 = vst [vmem:[#allocation10 + $0x8] sm:$0xff] %v2849_v41 }
 0xdf8   :  { %2112 = vst [vmem:[#allocation10 + $0x18] sm:$0xff] %v2851_v42 }
 0xdf9   :  { %2951 = shalt.err (!%p2948_p8)
}
 0xdfa   :  { %s2952_s10 = scalar_lea.hbm %s3296_s9, 512 }
 0xdfb   :  { %p2953_p9 = scmp.ne.s32.totalorder %s3296_s9, %s2952_s10  ;;  %p2956_p10 = scmp.lt.u32.totalorder %s2952_s10, %s3296_s9 }
 0xdfd   :  { %p2958_p11 = pnand %p2956_p10, %p2953_p9 }
 0xdff   :  { %2961 = shalt.err (!%p2958_p11)
}
 0xe00   :  { %2122 = dma.vmem_to_hbm [thread:$0]  %s2120_s8, 512, %s3296_s9, [#allocation4]  }
 0xe01   :  { %2968 = dma.done.wait [#allocation4], 512  }
 0xe02   :  { %2969 = vsyncadd [#allocation4], 4294966784 }
 0xe03   :  { %2126 = vsyncpa [#allocation3], 1 }
 0xe04   :  { %2127 = vsyncpa [#allocation6], 1 }
 0xe05   :  { %2128 = vsyncpa [#allocation9], 1 }
 0xe06   :  { %2129 = vsyncpa [#allocation4], 1 }

</bundles_post_ra>
